<compile_context>
chip_gen: v7x
topology: tpu7x:2x2x1
jax: 0.10.0
libtpu: 0.0.40
codegen_flags: <defaults>
</compile_context>

<pallas_src>
import functools

import jax
import jax.numpy as jnp
from jax.experimental import pallas as pl
from jax.experimental.pallas import tpu as pltpu


MM_DTYPE = jnp.bfloat16          # MXU operand dtype (accumulation stays f32)


# ---------------- configuration (mirrors `args` of the PyTorch module) -------
class Args:
    n_agents = 3
    n_actions = 5          # unused in forward()
    rnn_hidden_dim = 32
    task_rep_dim = 8
    use_ib = True
    n_heads = 4            # only divisibility-asserted in __init__
    atten_dim = 32         # not used in forward()


# ------------------------------- kernel --------------------------------------
def _encoder_kernel(
    state_ref, astate_ref, slab_ref,
    w_se_bd_ref, b_se_bd_ref, w_kv_bd_ref, b_kv_bd_ref,
    w_se_ref, b_se_ref, w_qx_ref, b_qx_ref,
    s_sum_ref, r_exp_ref, t_sum_ref,
    w_ih_a_ref, w_ih_b_ref, w_hh_ref, b_hh_ref,
    w_out_ref, b_out_ref,
    h_out_ref, p_out_ref,
    *, n_entities, hidden_dim, mm_dtype,
):
    f32 = jnp.float32
    E, H = n_entities, hidden_dim
    EH = E * H

    def mm(x, w):                                   # bf16 MXU matmul, f32 accumulate
        return jnp.dot(x.astype(mm_dtype), w, preferred_element_type=f32)

    # per-row slab: [h_prev(H) | girew(3H) | mask(E) | dead(1)], all lane slices
    slab = slab_ref[...]
    hprev = slab[:, :H]                                              # (M, H)
    girew = slab[:, H:4 * H]                                         # (M, 3H)
    mask = slab[:, 4 * H:4 * H + E] != 0.0                           # (M, E)
    dead = slab[:, 4 * H + E:] != 0.0                                # (M, 1)

    # ---- entity stream: embed / K / V, lane-packed (entity-major H blocks) ----
    embed = jnp.maximum(mm(state_ref[...], w_se_bd_ref[...]) + b_se_bd_ref[...], 0.0)
    kv = mm(embed, w_kv_bd_ref[...]) + b_kv_bd_ref[...]              # (M, 2*E*H)
    k = kv[:, :EH]                                                   # (M, E*H)
    v = jnp.maximum(kv[:, EH:], 0.0)                                 # (M, E*H)

    # ---- agent stream: own-entity embed + (pre-scaled) Q broadcast over entities ----
    aemb = jnp.maximum(mm(astate_ref[...], w_se_ref[...]) + b_se_ref[...], 0.0)  # (M, H)
    qx = mm(aemb, w_qx_ref[...]) + b_qx_ref[...]                     # (M, E*H)

    # ---- masked attention, all 2-D: score/softmax on (M, E) ----
    score = mm(qx * k, s_sum_ref[...])                               # (M, E), scale folded in
    NEG = f32(-1e30)
    s = jnp.where(mask, NEG, score)
    m = jnp.max(s, axis=-1, keepdims=True)
    pexp = jnp.where(mask, 0.0, jnp.exp(s - m))
    denom = jnp.sum(pexp, axis=-1, keepdims=True)
    w_att = jnp.where(denom > 0.0, pexp * pl.reciprocal(denom, approx=True), 0.0)

    wx = mm(w_att, r_exp_ref[...])                                   # (M, E*H) weight broadcast
    attn = mm(wx * v, t_sum_ref[...])                                # (M, H)

    # ---- GRU cell over all M = B*A rows (split w_ih halves -> no lane concat) ----
    gi = mm(aemb, w_ih_a_ref[...]) + mm(attn, w_ih_b_ref[...]) + girew          # (M, 3H)
    gh = jnp.dot(hprev, w_hh_ref[...], preferred_element_type=f32) + b_hh_ref[...]  # f32 path
    r = jax.nn.sigmoid(gi[:, :H] + gh[:, :H])
    z = jax.nn.sigmoid(gi[:, H:2 * H] + gh[:, H:2 * H])
    n = jnp.tanh(gi[:, 2 * H:] + r * gh[:, 2 * H:])
    h = (1.0 - z) * n + z * hprev                                    # (M, H)

    h = jnp.where(dead, 0.0, h)
    pout = mm(h, w_out_ref[...]) + b_out_ref[...]
    pout = jnp.where(dead, 0.0, pout)

    h_out_ref[...] = h
    p_out_ref[...] = pout


# ------------------------------- wrapper --------------------------------------
def task_recurrent_encoder_forward(p, state_inputs, pre_rew_inputs, obs_mask,
                                   scenario_mask, pre_hidden, args, *, b_tile=None):
    # NOTE: `task_index` of the original forward() is unused and therefore omitted.
    f32 = jnp.float32
    bs, E, edim = state_inputs.shape
    A = args.n_agents
    H = args.rnn_hidden_dim
    out_dim = args.task_rep_dim * 2 if args.use_ib else args.task_rep_dim
    inv_scale = 1.0 / (float(H // 1) ** 0.5)

    # batch tile: multiple of 16 (bf16 sublane packing of the (B*A, .) blocks);
    # default aims for >= 2 grid steps so both v7x TensorCores get work.
    if b_tile is None:
        half = -(-bs // 2)
        b_tile = min(128, max(16, ((half + 15) // 16) * 16))
    B = max(16, ((int(b_tile) + 15) // 16) * 16)
    bs_pad = pl.cdiv(bs, B) * B
    grid = (bs_pad // B,)
    M = B * A                       # rows per grid step (b-major, a-minor)
    rows, rows_pad = bs * A, bs_pad * A

    # ---- per-row inputs (plain-JAX glue; all 2-D, rows = batch*agent) ----
    state_flat = state_inputs.reshape(bs, E * edim).astype(f32)
    state_bc = jnp.repeat(state_flat, A, axis=0).astype(MM_DTYPE)        # (bs*A, E*edim)
    agent_state = state_inputs[:, :A, :].reshape(rows, edim).astype(MM_DTYPE)

    hprev = pre_hidden.reshape(rows, H).astype(f32)

    # reward encoder (rank-1 path) + b_ih folded into a per-row additive gate bias
    rew = pre_rew_inputs.reshape(bs, 1).astype(f32)
    rew_embed = jax.nn.relu(rew @ p["w_rew"] + p["b_rew"])               # (bs, R)
    girew = (rew_embed @ p["w_ih"][2 * H:] + p["b_ih"]).astype(f32)      # (bs, 3H)
    girew = jnp.repeat(girew, A, axis=0)                                 # (bs*A, 3H)

    # self-mask OR obs-mask (torch .to(bool) semantics), precomputed per row
    self_m = jnp.zeros((A, E), bool).at[:, :A].set(jnp.eye(A, dtype=bool))
    mask = jnp.logical_or(obs_mask[:, :A, :] != 0, self_m[None]).astype(f32)
    mask = mask.reshape(rows, E)
    scen = (scenario_mask[:, :A] != 0).astype(f32).reshape(rows, 1)

    slab = jnp.concatenate([hprev, girew, mask, scen], axis=1)           # (bs*A, 4H+E+1)

    if rows_pad != rows:
        padr = rows_pad - rows
        state_bc = jnp.pad(state_bc, ((0, padr), (0, 0)))
        agent_state = jnp.pad(agent_state, ((0, padr), (0, 0)))
        slab = jnp.pad(slab, ((0, padr), (0, 0)))

    # ---- weights: block-diagonal / tiled / constant matrices (built once) ----
    eyeE = jnp.eye(E, dtype=f32)
    w_se_bd = jnp.kron(eyeE, p["w_se"]).astype(MM_DTYPE)                 # (E*edim, E*H)
    b_se_bd = jnp.tile(p["b_se"], (1, E)).astype(f32)
    w_kv_bd = jnp.concatenate(
        [jnp.kron(eyeE, p["w_k"]), jnp.kron(eyeE, p["w_v"])], axis=1).astype(MM_DTYPE)
    b_kv_bd = jnp.concatenate(
        [jnp.tile(p["b_k"], (1, E)), jnp.tile(p["b_v"], (1, E))], axis=1).astype(f32)
    w_se_a = p["w_se"].astype(MM_DTYPE)
    b_se_a = p["b_se"].astype(f32)
    w_qx = (jnp.tile(p["w_q"], (1, E)) * inv_scale).astype(MM_DTYPE)     # (H, E*H), 1/sqrt(H) folded
    b_qx = (jnp.tile(p["b_q"], (1, E)) * inv_scale).astype(f32)
    s_sum_f = jnp.repeat(eyeE, H, axis=0)                                # (E*H, E)
    s_sum = s_sum_f.astype(MM_DTYPE)
    r_exp = s_sum_f.T.astype(MM_DTYPE)                                   # (E, E*H)
    t_sum = jnp.tile(jnp.eye(H, dtype=f32), (E, 1)).astype(MM_DTYPE)     # (E*H, H)
    w_ih_a = p["w_ih"][:H].astype(MM_DTYPE)                              # emb half
    w_ih_b = p["w_ih"][H:2 * H].astype(MM_DTYPE)                         # atten half
    w_hh = p["w_hh"].astype(f32)                                         # f32 recurrent path
    b_hh = p["b_hh"].astype(f32)
    w_out = p["w_out"].astype(MM_DTYPE)
    b_out = p["b_out"].astype(f32)

    # ---- pallas_call ----
    kernel = functools.partial(_encoder_kernel, n_entities=E, hidden_dim=H,
                               mm_dtype=MM_DTYPE)

    def row_spec(width):
        return pl.BlockSpec((M, width), lambda i: (i, 0))

    def full_spec(arr):
        return pl.BlockSpec(arr.shape, lambda i: (0, 0))

    weights = (w_se_bd, b_se_bd, w_kv_bd, b_kv_bd, w_se_a, b_se_a,
               w_qx, b_qx, s_sum, r_exp, t_sum,
               w_ih_a, w_ih_b, w_hh, b_hh, w_out, b_out)

    in_specs = [row_spec(E * edim), row_spec(edim), row_spec(4 * H + E + 1)]
    in_specs += [full_spec(w) for w in weights]
    out_specs = (pl.BlockSpec((M, H), lambda i: (i, 0)),
                 pl.BlockSpec((M, out_dim), lambda i: (i, 0)))
    out_shape = (jax.ShapeDtypeStruct((rows_pad, H), f32),
                 jax.ShapeDtypeStruct((rows_pad, out_dim), f32))

    h_flat, p_flat = pl.pallas_call(
        kernel,
        grid=grid,
        in_specs=in_specs,
        out_specs=out_specs,
        out_shape=out_shape,
        compiler_params=pltpu.CompilerParams(
            dimension_semantics=("parallel",),
            vmem_limit_bytes=32 * 1024 * 1024),
    )(state_bc, agent_state, slab, *weights)

    h_out = h_flat[:rows].reshape(bs, A, H)
    params_out = p_flat[:rows].reshape(bs, A, out_dim)
    return params_out, h_out


# -------------------------- parameter init (deterministic) -------------------
def init_params(key, input_dim, args):
    H = args.rnn_hidden_dim
    R = H // 8
    out_dim = args.task_rep_dim * 2 if args.use_ib else args.task_rep_dim
    in_rnn = 2 * H + R

    def linear(k, fan_in, fan_out):
        kw, kb = jax.random.split(k)
        bound = 1.0 / (fan_in ** 0.5)
        w = jax.random.uniform(kw, (fan_in, fan_out), jnp.float32, -bound, bound)
        b = jax.random.uniform(kb, (1, fan_out), jnp.float32, -bound, bound)
        return w, b

    ks = jax.random.split(key, 8)
    p = {}
    p["w_se"], p["b_se"] = linear(ks[0], input_dim, H)
    p["w_q"], p["b_q"] = linear(ks[1], H, H)
    p["w_k"], p["b_k"] = linear(ks[2], H, H)
    p["w_v"], p["b_v"] = linear(ks[3], H, H)
    p["w_rew"], p["b_rew"] = linear(ks[4], 1, R)
    p["w_ih"], p["b_ih"] = linear(ks[5], in_rnn, 3 * H)
    p["w_hh"], p["b_hh"] = linear(ks[6], H, 3 * H)
    p["w_out"], p["b_out"] = linear(ks[7], H, out_dim)
    return p


# -------------------------- pure-JAX reference (for checking) ----------------
def reference_forward(p, state_inputs, pre_rew_inputs, obs_mask, scenario_mask,
                      pre_hidden, args):
    bs, E, _ = state_inputs.shape
    A, H = args.n_agents, args.rnn_hidden_dim

    embed = jax.nn.relu(state_inputs @ p["w_se"] + p["b_se"])
    q = embed @ p["w_q"] + p["b_q"]
    k = embed @ p["w_k"] + p["b_k"]
    v = jax.nn.relu(embed @ p["w_v"] + p["b_v"])
    score = jnp.einsum("bah,bkh->bak", q[:, :A, :], k) / jnp.sqrt(jnp.float32(H))

    padded = jnp.zeros((A, E)).at[:, :A].set(jnp.eye(A)).astype(bool)[None]
    obs_m = obs_mask[:, :A, :].astype(bool)
    score = jnp.where(padded, -jnp.inf, score)
    score = jnp.where(obs_m, -jnp.inf, score)
    m = jnp.max(score, axis=-1, keepdims=True)
    e = jnp.exp(score - m)
    w = e / jnp.sum(e, axis=-1, keepdims=True)
    w = jnp.where(jnp.isnan(w), 0.0, w)

    atten = jnp.einsum("bak,bkh->bah", w, v).reshape(-1, H)
    agent_embed = embed[:, :A, :].reshape(-1, H)
    rew = jnp.broadcast_to(pre_rew_inputs[:, None, :], (bs, A, 1)).reshape(-1, 1)
    rew_embed = jax.nn.relu(rew @ p["w_rew"] + p["b_rew"])
    x = jnp.concatenate([agent_embed, atten, rew_embed], axis=-1)

    h_prev = pre_hidden.reshape(-1, H)
    gi = x @ p["w_ih"] + p["b_ih"]
    gh = h_prev @ p["w_hh"] + p["b_hh"]
    r = jax.nn.sigmoid(gi[:, :H] + gh[:, :H])
    z = jax.nn.sigmoid(gi[:, H:2 * H] + gh[:, H:2 * H])
    n = jnp.tanh(gi[:, 2 * H:] + r * gh[:, 2 * H:])
    h = ((1.0 - z) * n + z * h_prev).reshape(bs, A, H)

    am = scenario_mask[:, :A].astype(bool)[..., None]
    h = jnp.where(am, 0.0, h)
    out = h @ p["w_out"] + p["b_out"]
    out = jnp.where(am, 0.0, out)
    return out, h


# --------------------------------- main ---------------------------------------
def _make_inputs(key, bs, n_entities, input_dim, args):
    k1, k2, k3, k4, k5 = jax.random.split(key, 5)
    state_inputs = jax.random.normal(k1, (bs, n_entities, input_dim), jnp.float32)
    pre_rew_inputs = jax.random.normal(k2, (bs, 1), jnp.float32)
    obs_mask = (jax.random.uniform(k3, (bs, n_entities, n_entities)) < 0.3).astype(jnp.float32)
    scenario_mask = (jax.random.uniform(k4, (bs, n_entities)) < 0.2).astype(jnp.float32)
    pre_hidden = 0.1 * jax.random.normal(
        k5, (bs, args.n_agents, args.rnn_hidden_dim), jnp.float32)
    return state_inputs, pre_rew_inputs, obs_mask, scenario_mask, pre_hidden


if __name__ == "__main__":
    args = Args()
    n_entities, input_dim = 8, 10

    key = jax.random.PRNGKey(0)
    k_in, k_in2, k_p = jax.random.split(key, 3)
    params = init_params(k_p, input_dim, args)

    # ---- test 1: small batch, single grid step ----
    bs = 2
    inputs = _make_inputs(k_in, bs, n_entities, input_dim, args)
    out_params, h_out = task_recurrent_encoder_forward(params, *inputs, args)
    jax.block_until_ready((out_params, h_out))
    ref_params, ref_h = reference_forward(params, *inputs, args)
    jax.block_until_ready((ref_params, ref_h))
    err_p = float(jnp.max(jnp.abs(out_params - ref_params)))
    err_h = float(jnp.max(jnp.abs(h_out - ref_h)))
    assert err_p < 3e-2 and err_h < 3e-2, (err_p, err_h)
    assert out_params.shape == (bs, args.n_agents, 2 * args.task_rep_dim)
    assert h_out.shape == (bs, args.n_agents, args.rnn_hidden_dim)

    # ---- test 2: batch not divisible by the tile -> grid > 1 + row padding ----
    bs2 = 37
    inputs2 = _make_inputs(k_in2, bs2, n_entities, input_dim, args)
    out_params2, h_out2 = task_recurrent_encoder_forward(params, *inputs2, args, b_tile=16)
    jax.block_until_ready((out_params2, h_out2))
    ref_params2, ref_h2 = reference_forward(params, *inputs2, args)
    err_p2 = float(jnp.max(jnp.abs(out_params2 - ref_params2)))
    err_h2 = float(jnp.max(jnp.abs(h_out2 - ref_h2)))
    assert err_p2 < 3e-2 and err_h2 < 3e-2, (err_p2, err_h2)
    assert out_params2.shape == (bs2, args.n_agents, 2 * args.task_rep_dim)
    assert h_out2.shape == (bs2, args.n_agents, args.rnn_hidden_dim)

    print("KERNEL_OK")
</pallas_src>

<mosaic_0001>
module attributes {stable_mosaic.version = 11 : i64} {
  func.func @_encoder_kernel(%arg0: i32, %arg1: memref<48x80xbf16, #tpu.memory_space<vmem>>, %arg2: memref<48x10xbf16, #tpu.memory_space<vmem>>, %arg3: memref<48x137xf32, #tpu.memory_space<vmem>>, %arg4: memref<80x256xbf16, #tpu.memory_space<vmem>>, %arg5: memref<1x256xf32, #tpu.memory_space<vmem>>, %arg6: memref<256x512xbf16, #tpu.memory_space<vmem>>, %arg7: memref<1x512xf32, #tpu.memory_space<vmem>>, %arg8: memref<10x32xbf16, #tpu.memory_space<vmem>>, %arg9: memref<1x32xf32, #tpu.memory_space<vmem>>, %arg10: memref<32x256xbf16, #tpu.memory_space<vmem>>, %arg11: memref<1x256xf32, #tpu.memory_space<vmem>>, %arg12: memref<256x8xbf16, #tpu.memory_space<vmem>>, %arg13: memref<8x256xbf16, #tpu.memory_space<vmem>>, %arg14: memref<256x32xbf16, #tpu.memory_space<vmem>>, %arg15: memref<32x96xbf16, #tpu.memory_space<vmem>>, %arg16: memref<32x96xbf16, #tpu.memory_space<vmem>>, %arg17: memref<32x96xf32, #tpu.memory_space<vmem>>, %arg18: memref<1x96xf32, #tpu.memory_space<vmem>>, %arg19: memref<32x16xbf16, #tpu.memory_space<vmem>>, %arg20: memref<1x16xf32, #tpu.memory_space<vmem>>, %arg21: memref<48x32xf32, #tpu.memory_space<vmem>>, %arg22: memref<48x16xf32, #tpu.memory_space<vmem>>) attributes {dimension_semantics = [#tpu.dimension_semantics<parallel>], iteration_bounds = array<i64: 1>, scalar_prefetch = 0 : i64, scratch_operands = 0 : i64, tpu.core_type = #tpu.core_type<tc>, window_params = [{transform_indices = @transform_0, window_bounds = array<i64: 48, 80>}, {transform_indices = @transform_1, window_bounds = array<i64: 48, 10>}, {transform_indices = @transform_2, window_bounds = array<i64: 48, 137>}, {pipeline_mode = #tpu.pipeline_mode<synchronous>, transform_indices = @transform_3, window_bounds = array<i64: 80, 256>}, {pipeline_mode = #tpu.pipeline_mode<synchronous>, transform_indices = @transform_4, window_bounds = array<i64: 1, 256>}, {pipeline_mode = #tpu.pipeline_mode<synchronous>, transform_indices = @transform_5, window_bounds = array<i64: 256, 512>}, {pipeline_mode = #tpu.pipeline_mode<synchronous>, transform_indices = @transform_6, window_bounds = array<i64: 1, 512>}, {pipeline_mode = #tpu.pipeline_mode<synchronous>, transform_indices = @transform_7, window_bounds = array<i64: 10, 32>}, {pipeline_mode = #tpu.pipeline_mode<synchronous>, transform_indices = @transform_8, window_bounds = array<i64: 1, 32>}, {pipeline_mode = #tpu.pipeline_mode<synchronous>, transform_indices = @transform_9, window_bounds = array<i64: 32, 256>}, {pipeline_mode = #tpu.pipeline_mode<synchronous>, transform_indices = @transform_10, window_bounds = array<i64: 1, 256>}, {pipeline_mode = #tpu.pipeline_mode<synchronous>, transform_indices = @transform_11, window_bounds = array<i64: 256, 8>}, {pipeline_mode = #tpu.pipeline_mode<synchronous>, transform_indices = @transform_12, window_bounds = array<i64: 8, 256>}, {pipeline_mode = #tpu.pipeline_mode<synchronous>, transform_indices = @transform_13, window_bounds = array<i64: 256, 32>}, {pipeline_mode = #tpu.pipeline_mode<synchronous>, transform_indices = @transform_14, window_bounds = array<i64: 32, 96>}, {pipeline_mode = #tpu.pipeline_mode<synchronous>, transform_indices = @transform_15, window_bounds = array<i64: 32, 96>}, {pipeline_mode = #tpu.pipeline_mode<synchronous>, transform_indices = @transform_16, window_bounds = array<i64: 32, 96>}, {pipeline_mode = #tpu.pipeline_mode<synchronous>, transform_indices = @transform_17, window_bounds = array<i64: 1, 96>}, {pipeline_mode = #tpu.pipeline_mode<synchronous>, transform_indices = @transform_18, window_bounds = array<i64: 32, 16>}, {pipeline_mode = #tpu.pipeline_mode<synchronous>, transform_indices = @transform_19, window_bounds = array<i64: 1, 16>}, {transform_indices = @transform_20, window_bounds = array<i64: 48, 32>}, {transform_indices = @transform_21, window_bounds = array<i64: 48, 16>}]} {
    %c0 = arith.constant 0 : index
    %c0_0 = arith.constant 0 : index
    %0 = vector.load %arg3[%c0, %c0_0] : memref<48x137xf32, #tpu.memory_space<vmem>>, vector<48x137xf32>
    %1 = vector.extract_strided_slice %0 {offsets = [0, 0], sizes = [48, 32], strides = [1, 1]} : vector<48x137xf32> to vector<48x32xf32>
    %2 = vector.extract_strided_slice %0 {offsets = [0, 32], sizes = [48, 96], strides = [1, 1]} : vector<48x137xf32> to vector<48x96xf32>
    %3 = vector.extract_strided_slice %0 {offsets = [0, 128], sizes = [48, 8], strides = [1, 1]} : vector<48x137xf32> to vector<48x8xf32>
    %cst = arith.constant 0.000000e+00 : f32
    %4 = vector.broadcast %cst : f32 to vector<48x8xf32>
    %5 = arith.cmpf one, %3, %4 : vector<48x8xf32>
    %6 = vector.extract_strided_slice %0 {offsets = [0, 136], sizes = [48, 1], strides = [1, 1]} : vector<48x137xf32> to vector<48x1xf32>
    %cst_1 = arith.constant 0.000000e+00 : f32
    %7 = vector.broadcast %cst_1 : f32 to vector<48x1xf32>
    %8 = arith.cmpf one, %6, %7 : vector<48x1xf32>
    %c0_2 = arith.constant 0 : index
    %c0_3 = arith.constant 0 : index
    %9 = vector.load %arg1[%c0_2, %c0_3] : memref<48x80xbf16, #tpu.memory_space<vmem>>, vector<48x80xbf16>
    %c0_4 = arith.constant 0 : index
    %c0_5 = arith.constant 0 : index
    %10 = vector.load %arg4[%c0_4, %c0_5] : memref<80x256xbf16, #tpu.memory_space<vmem>>, vector<80x256xbf16>
    %cst_6 = arith.constant dense<0.000000e+00> : vector<48x256xf32>
    %11 = tpu.matmul %9, %10, %cst_6 {dimension_numbers = #tpu.dot_dimension_numbers<[1], [0], [0], [1], [0, 0, 1, 1], [], []>} : vector<48x80xbf16>, vector<80x256xbf16>, vector<48x256xf32> -> vector<48x256xf32>
    %c0_7 = arith.constant 0 : index
    %c0_8 = arith.constant 0 : index
    %12 = vector.load %arg5[%c0_7, %c0_8] : memref<1x256xf32, #tpu.memory_space<vmem>>, vector<1x256xf32>
    %13 = vector.broadcast %12 : vector<1x256xf32> to vector<48x256xf32>
    %14 = arith.addf %11, %13 : vector<48x256xf32>
    %cst_9 = arith.constant 0.000000e+00 : f32
    %15 = vector.broadcast %cst_9 : f32 to vector<48x256xf32>
    %16 = arith.maximumf %14, %15 : vector<48x256xf32>
    %c0_10 = arith.constant 0 : index
    %c0_11 = arith.constant 0 : index
    %17 = vector.load %arg6[%c0_10, %c0_11] : memref<256x512xbf16, #tpu.memory_space<vmem>>, vector<256x512xbf16>
    %18 = arith.truncf %16 : vector<48x256xf32> to vector<48x256xbf16>
    %cst_12 = arith.constant dense<0.000000e+00> : vector<48x512xf32>
    %19 = tpu.matmul %18, %17, %cst_12 {dimension_numbers = #tpu.dot_dimension_numbers<[1], [0], [0], [1], [0, 0, 1, 1], [], []>} : vector<48x256xbf16>, vector<256x512xbf16>, vector<48x512xf32> -> vector<48x512xf32>
    %c0_13 = arith.constant 0 : index
    %c0_14 = arith.constant 0 : index
    %20 = vector.load %arg7[%c0_13, %c0_14] : memref<1x512xf32, #tpu.memory_space<vmem>>, vector<1x512xf32>
    %21 = vector.broadcast %20 : vector<1x512xf32> to vector<48x512xf32>
    %22 = arith.addf %19, %21 : vector<48x512xf32>
    %23 = vector.extract_strided_slice %22 {offsets = [0, 0], sizes = [48, 256], strides = [1, 1]} : vector<48x512xf32> to vector<48x256xf32>
    %24 = vector.extract_strided_slice %22 {offsets = [0, 256], sizes = [48, 256], strides = [1, 1]} : vector<48x512xf32> to vector<48x256xf32>
    %cst_15 = arith.constant 0.000000e+00 : f32
    %25 = vector.broadcast %cst_15 : f32 to vector<48x256xf32>
    %26 = arith.maximumf %24, %25 : vector<48x256xf32>
    %c0_16 = arith.constant 0 : index
    %c0_17 = arith.constant 0 : index
    %27 = vector.load %arg2[%c0_16, %c0_17] : memref<48x10xbf16, #tpu.memory_space<vmem>>, vector<48x10xbf16>
    %c0_18 = arith.constant 0 : index
    %c0_19 = arith.constant 0 : index
    %28 = vector.load %arg8[%c0_18, %c0_19] : memref<10x32xbf16, #tpu.memory_space<vmem>>, vector<10x32xbf16>
    %cst_20 = arith.constant dense<0.000000e+00> : vector<48x32xf32>
    %29 = tpu.matmul %27, %28, %cst_20 {dimension_numbers = #tpu.dot_dimension_numbers<[1], [0], [0], [1], [0, 0, 1, 1], [], []>} : vector<48x10xbf16>, vector<10x32xbf16>, vector<48x32xf32> -> vector<48x32xf32>
    %c0_21 = arith.constant 0 : index
    %c0_22 = arith.constant 0 : index
    %30 = vector.load %arg9[%c0_21, %c0_22] : memref<1x32xf32, #tpu.memory_space<vmem>>, vector<1x32xf32>
    %31 = vector.broadcast %30 : vector<1x32xf32> to vector<48x32xf32>
    %32 = arith.addf %29, %31 : vector<48x32xf32>
    %cst_23 = arith.constant 0.000000e+00 : f32
    %33 = vector.broadcast %cst_23 : f32 to vector<48x32xf32>
    %34 = arith.maximumf %32, %33 : vector<48x32xf32>
    %c0_24 = arith.constant 0 : index
    %c0_25 = arith.constant 0 : index
    %35 = vector.load %arg10[%c0_24, %c0_25] : memref<32x256xbf16, #tpu.memory_space<vmem>>, vector<32x256xbf16>
    %36 = arith.truncf %34 : vector<48x32xf32> to vector<48x32xbf16>
    %cst_26 = arith.constant dense<0.000000e+00> : vector<48x256xf32>
    %37 = tpu.matmul %36, %35, %cst_26 {dimension_numbers = #tpu.dot_dimension_numbers<[1], [0], [0], [1], [0, 0, 1, 1], [], []>} : vector<48x32xbf16>, vector<32x256xbf16>, vector<48x256xf32> -> vector<48x256xf32>
    %c0_27 = arith.constant 0 : index
    %c0_28 = arith.constant 0 : index
    %38 = vector.load %arg11[%c0_27, %c0_28] : memref<1x256xf32, #tpu.memory_space<vmem>>, vector<1x256xf32>
    %39 = vector.broadcast %38 : vector<1x256xf32> to vector<48x256xf32>
    %40 = arith.addf %37, %39 : vector<48x256xf32>
    %41 = arith.mulf %40, %23 : vector<48x256xf32>
    %c0_29 = arith.constant 0 : index
    %c0_30 = arith.constant 0 : index
    %42 = vector.load %arg12[%c0_29, %c0_30] : memref<256x8xbf16, #tpu.memory_space<vmem>>, vector<256x8xbf16>
    %43 = arith.truncf %41 : vector<48x256xf32> to vector<48x256xbf16>
    %cst_31 = arith.constant dense<0.000000e+00> : vector<48x8xf32>
    %44 = tpu.matmul %43, %42, %cst_31 {dimension_numbers = #tpu.dot_dimension_numbers<[1], [0], [0], [1], [0, 0, 1, 1], [], []>} : vector<48x256xbf16>, vector<256x8xbf16>, vector<48x8xf32> -> vector<48x8xf32>
    %cst_32 = arith.constant -1.000000e+30 : f32
    %45 = vector.broadcast %cst_32 : f32 to vector<48x8xf32>
    %46 = arith.select %5, %45, %44 : vector<48x8xi1>, vector<48x8xf32>
    %cst_33 = arith.constant dense<0xFF800000> : vector<48xf32>
    %47 = vector.multi_reduction <maximumf>, %46, %cst_33 [1] : vector<48x8xf32> to vector<48xf32>
    %48 = vector.shape_cast %47 : vector<48xf32> to vector<48x1xf32>
    %49 = vector.broadcast %48 : vector<48x1xf32> to vector<48x8xf32>
    %50 = arith.subf %46, %49 : vector<48x8xf32>
    %51 = math.exp %50 : vector<48x8xf32>
    %cst_34 = arith.constant 0.000000e+00 : f32
    %52 = vector.broadcast %cst_34 : f32 to vector<48x8xf32>
    %53 = arith.select %5, %52, %51 : vector<48x8xi1>, vector<48x8xf32>
    %cst_35 = arith.constant dense<0.000000e+00> : vector<48xf32>
    %54 = vector.multi_reduction <add>, %53, %cst_35 [1] : vector<48x8xf32> to vector<48xf32>
    %55 = vector.shape_cast %54 : vector<48xf32> to vector<48x1xf32>
    %cst_36 = arith.constant 0.000000e+00 : f32
    %56 = vector.broadcast %cst_36 : f32 to vector<48x1xf32>
    %57 = arith.cmpf ogt, %55, %56 : vector<48x1xf32>
    %58 = tpu.reciprocal %55 {approx = true} : vector<48x1xf32> -> vector<48x1xf32>
    %59 = vector.broadcast %58 : vector<48x1xf32> to vector<48x8xf32>
    %60 = arith.mulf %53, %59 : vector<48x8xf32>
    %cst_37 = arith.constant 0.000000e+00 : f32
    %61 = vector.shape_cast %57 : vector<48x1xi1> to vector<48x1xi1>
    %62 = vector.broadcast %61 : vector<48x1xi1> to vector<48x8xi1>
    %63 = vector.broadcast %cst_37 : f32 to vector<48x8xf32>
    %64 = arith.select %62, %60, %63 : vector<48x8xi1>, vector<48x8xf32>
    %c0_38 = arith.constant 0 : index
    %c0_39 = arith.constant 0 : index
    %65 = vector.load %arg13[%c0_38, %c0_39] : memref<8x256xbf16, #tpu.memory_space<vmem>>, vector<8x256xbf16>
    %66 = arith.truncf %64 : vector<48x8xf32> to vector<48x8xbf16>
    %cst_40 = arith.constant dense<0.000000e+00> : vector<48x256xf32>
    %67 = tpu.matmul %66, %65, %cst_40 {dimension_numbers = #tpu.dot_dimension_numbers<[1], [0], [0], [1], [0, 0, 1, 1], [], []>} : vector<48x8xbf16>, vector<8x256xbf16>, vector<48x256xf32> -> vector<48x256xf32>
    %68 = arith.mulf %67, %26 : vector<48x256xf32>
    %c0_41 = arith.constant 0 : index
    %c0_42 = arith.constant 0 : index
    %69 = vector.load %arg14[%c0_41, %c0_42] : memref<256x32xbf16, #tpu.memory_space<vmem>>, vector<256x32xbf16>
    %70 = arith.truncf %68 : vector<48x256xf32> to vector<48x256xbf16>
    %cst_43 = arith.constant dense<0.000000e+00> : vector<48x32xf32>
    %71 = tpu.matmul %70, %69, %cst_43 {dimension_numbers = #tpu.dot_dimension_numbers<[1], [0], [0], [1], [0, 0, 1, 1], [], []>} : vector<48x256xbf16>, vector<256x32xbf16>, vector<48x32xf32> -> vector<48x32xf32>
    %c0_44 = arith.constant 0 : index
    %c0_45 = arith.constant 0 : index
    %72 = vector.load %arg15[%c0_44, %c0_45] : memref<32x96xbf16, #tpu.memory_space<vmem>>, vector<32x96xbf16>
    %73 = arith.truncf %34 : vector<48x32xf32> to vector<48x32xbf16>
    %cst_46 = arith.constant dense<0.000000e+00> : vector<48x96xf32>
    %74 = tpu.matmul %73, %72, %cst_46 {dimension_numbers = #tpu.dot_dimension_numbers<[1], [0], [0], [1], [0, 0, 1, 1], [], []>} : vector<48x32xbf16>, vector<32x96xbf16>, vector<48x96xf32> -> vector<48x96xf32>
    %c0_47 = arith.constant 0 : index
    %c0_48 = arith.constant 0 : index
    %75 = vector.load %arg16[%c0_47, %c0_48] : memref<32x96xbf16, #tpu.memory_space<vmem>>, vector<32x96xbf16>
    %76 = arith.truncf %71 : vector<48x32xf32> to vector<48x32xbf16>
    %cst_49 = arith.constant dense<0.000000e+00> : vector<48x96xf32>
    %77 = tpu.matmul %76, %75, %cst_49 {dimension_numbers = #tpu.dot_dimension_numbers<[1], [0], [0], [1], [0, 0, 1, 1], [], []>} : vector<48x32xbf16>, vector<32x96xbf16>, vector<48x96xf32> -> vector<48x96xf32>
    %78 = arith.addf %74, %77 : vector<48x96xf32>
    %79 = arith.addf %78, %2 : vector<48x96xf32>
    %c0_50 = arith.constant 0 : index
    %c0_51 = arith.constant 0 : index
    %80 = vector.load %arg17[%c0_50, %c0_51] : memref<32x96xf32, #tpu.memory_space<vmem>>, vector<32x96xf32>
    %cst_52 = arith.constant dense<0.000000e+00> : vector<48x96xf32>
    %81 = tpu.matmul %1, %80, %cst_52 {dimension_numbers = #tpu.dot_dimension_numbers<[1], [0], [0], [1], [0, 0, 1, 1], [], []>} : vector<48x32xf32>, vector<32x96xf32>, vector<48x96xf32> -> vector<48x96xf32>
    %c0_53 = arith.constant 0 : index
    %c0_54 = arith.constant 0 : index
    %82 = vector.load %arg18[%c0_53, %c0_54] : memref<1x96xf32, #tpu.memory_space<vmem>>, vector<1x96xf32>
    %83 = vector.broadcast %82 : vector<1x96xf32> to vector<48x96xf32>
    %84 = arith.addf %81, %83 : vector<48x96xf32>
    %85 = vector.extract_strided_slice %79 {offsets = [0, 0], sizes = [48, 32], strides = [1, 1]} : vector<48x96xf32> to vector<48x32xf32>
    %86 = vector.extract_strided_slice %84 {offsets = [0, 0], sizes = [48, 32], strides = [1, 1]} : vector<48x96xf32> to vector<48x32xf32>
    %87 = arith.addf %85, %86 : vector<48x32xf32>
    %88 = arith.negf %87 : vector<48x32xf32>
    %89 = math.exp %88 : vector<48x32xf32>
    %cst_55 = arith.constant 1.000000e+00 : f32
    %90 = vector.broadcast %cst_55 : f32 to vector<48x32xf32>
    %91 = arith.addf %90, %89 : vector<48x32xf32>
    %92 = arith.divf %90, %91 : vector<48x32xf32>
    %93 = vector.extract_strided_slice %79 {offsets = [0, 32], sizes = [48, 32], strides = [1, 1]} : vector<48x96xf32> to vector<48x32xf32>
    %94 = vector.extract_strided_slice %84 {offsets = [0, 32], sizes = [48, 32], strides = [1, 1]} : vector<48x96xf32> to vector<48x32xf32>
    %95 = arith.addf %93, %94 : vector<48x32xf32>
    %96 = arith.negf %95 : vector<48x32xf32>
    %97 = math.exp %96 : vector<48x32xf32>
    %cst_56 = arith.constant 1.000000e+00 : f32
    %98 = vector.broadcast %cst_56 : f32 to vector<48x32xf32>
    %99 = arith.addf %98, %97 : vector<48x32xf32>
    %100 = arith.divf %98, %99 : vector<48x32xf32>
    %101 = vector.extract_strided_slice %79 {offsets = [0, 64], sizes = [48, 32], strides = [1, 1]} : vector<48x96xf32> to vector<48x32xf32>
    %102 = vector.extract_strided_slice %84 {offsets = [0, 64], sizes = [48, 32], strides = [1, 1]} : vector<48x96xf32> to vector<48x32xf32>
    %103 = arith.mulf %92, %102 : vector<48x32xf32>
    %104 = arith.addf %101, %103 : vector<48x32xf32>
    %105 = math.tanh %104 : vector<48x32xf32>
    %cst_57 = arith.constant 1.000000e+00 : f32
    %106 = vector.broadcast %cst_57 : f32 to vector<48x32xf32>
    %107 = arith.subf %106, %100 : vector<48x32xf32>
    %108 = arith.mulf %107, %105 : vector<48x32xf32>
    %109 = arith.mulf %100, %1 : vector<48x32xf32>
    %110 = arith.addf %108, %109 : vector<48x32xf32>
    %cst_58 = arith.constant 0.000000e+00 : f32
    %111 = vector.shape_cast %8 : vector<48x1xi1> to vector<48x1xi1>
    %112 = vector.broadcast %111 : vector<48x1xi1> to vector<48x32xi1>
    %113 = vector.broadcast %cst_58 : f32 to vector<48x32xf32>
    %114 = arith.select %112, %113, %110 : vector<48x32xi1>, vector<48x32xf32>
    %c0_59 = arith.constant 0 : index
    %c0_60 = arith.constant 0 : index
    %115 = vector.load %arg19[%c0_59, %c0_60] : memref<32x16xbf16, #tpu.memory_space<vmem>>, vector<32x16xbf16>
    %116 = arith.truncf %114 : vector<48x32xf32> to vector<48x32xbf16>
    %cst_61 = arith.constant dense<0.000000e+00> : vector<48x16xf32>
    %117 = tpu.matmul %116, %115, %cst_61 {dimension_numbers = #tpu.dot_dimension_numbers<[1], [0], [0], [1], [0, 0, 1, 1], [], []>} : vector<48x32xbf16>, vector<32x16xbf16>, vector<48x16xf32> -> vector<48x16xf32>
    %c0_62 = arith.constant 0 : index
    %c0_63 = arith.constant 0 : index
    %118 = vector.load %arg20[%c0_62, %c0_63] : memref<1x16xf32, #tpu.memory_space<vmem>>, vector<1x16xf32>
    %119 = vector.broadcast %118 : vector<1x16xf32> to vector<48x16xf32>
    %120 = arith.addf %117, %119 : vector<48x16xf32>
    %cst_64 = arith.constant 0.000000e+00 : f32
    %121 = vector.shape_cast %8 : vector<48x1xi1> to vector<48x1xi1>
    %122 = vector.broadcast %121 : vector<48x1xi1> to vector<48x16xi1>
    %123 = vector.broadcast %cst_64 : f32 to vector<48x16xf32>
    %124 = arith.select %122, %123, %120 : vector<48x16xi1>, vector<48x16xf32>
    %c0_65 = arith.constant 0 : index
    %c0_66 = arith.constant 0 : index
    %125 = vector.load %arg21[%c0_65, %c0_66] : memref<48x32xf32, #tpu.memory_space<vmem>>, vector<48x32xf32>
    tpu.vector_store %arg21[%c0_65, %c0_66], %114 {strides = array<i32>} : memref<48x32xf32, #tpu.memory_space<vmem>>, vector<48x32xf32>,
    %c0_67 = arith.constant 0 : index
    %c0_68 = arith.constant 0 : index
    %126 = vector.load %arg22[%c0_67, %c0_68] : memref<48x16xf32, #tpu.memory_space<vmem>>, vector<48x16xf32>
    tpu.vector_store %arg22[%c0_67, %c0_68], %124 {strides = array<i32>} : memref<48x16xf32, #tpu.memory_space<vmem>>, vector<48x16xf32>,
    return
  }
  func.func @transform_0(%arg0: i32) -> (i32, i32) {
    %c0_i32 = arith.constant 0 : i32
    %c0_i32_0 = arith.constant 0 : i32
    return %arg0, %c0_i32 : i32, i32
  }
  func.func @transform_1(%arg0: i32) -> (i32, i32) {
    %c0_i32 = arith.constant 0 : i32
    %c0_i32_0 = arith.constant 0 : i32
    return %arg0, %c0_i32 : i32, i32
  }
  func.func @transform_2(%arg0: i32) -> (i32, i32) {
    %c0_i32 = arith.constant 0 : i32
    %c0_i32_0 = arith.constant 0 : i32
    return %arg0, %c0_i32 : i32, i32
  }
  func.func @transform_3(%arg0: i32) -> (i32, i32) {
    %c0_i32 = arith.constant 0 : i32
    %c0_i32_0 = arith.constant 0 : i32
    %c0_i32_1 = arith.constant 0 : i32
    return %c0_i32, %c0_i32_0 : i32, i32
  }
  func.func @transform_4(%arg0: i32) -> (i32, i32) {
    %c0_i32 = arith.constant 0 : i32
    %c0_i32_0 = arith.constant 0 : i32
    %c0_i32_1 = arith.constant 0 : i32
    return %c0_i32, %c0_i32_0 : i32, i32
  }
  func.func @transform_5(%arg0: i32) -> (i32, i32) {
    %c0_i32 = arith.constant 0 : i32
    %c0_i32_0 = arith.constant 0 : i32
    %c0_i32_1 = arith.constant 0 : i32
    return %c0_i32, %c0_i32_0 : i32, i32
  }
  func.func @transform_6(%arg0: i32) -> (i32, i32) {
    %c0_i32 = arith.constant 0 : i32
    %c0_i32_0 = arith.constant 0 : i32
    %c0_i32_1 = arith.constant 0 : i32
    return %c0_i32, %c0_i32_0 : i32, i32
  }
  func.func @transform_7(%arg0: i32) -> (i32, i32) {
    %c0_i32 = arith.constant 0 : i32
    %c0_i32_0 = arith.constant 0 : i32
    %c0_i32_1 = arith.constant 0 : i32
    return %c0_i32, %c0_i32_0 : i32, i32
  }
  func.func @transform_8(%arg0: i32) -> (i32, i32) {
    %c0_i32 = arith.constant 0 : i32
    %c0_i32_0 = arith.constant 0 : i32
    %c0_i32_1 = arith.constant 0 : i32
    return %c0_i32, %c0_i32_0 : i32, i32
  }
  func.func @transform_9(%arg0: i32) -> (i32, i32) {
    %c0_i32 = arith.constant 0 : i32
    %c0_i32_0 = arith.constant 0 : i32
    %c0_i32_1 = arith.constant 0 : i32
    return %c0_i32, %c0_i32_0 : i32, i32
  }
  func.func @transform_10(%arg0: i32) -> (i32, i32) {
    %c0_i32 = arith.constant 0 : i32
    %c0_i32_0 = arith.constant 0 : i32
    %c0_i32_1 = arith.constant 0 : i32
    return %c0_i32, %c0_i32_0 : i32, i32
  }
  func.func @transform_11(%arg0: i32) -> (i32, i32) {
    %c0_i32 = arith.constant 0 : i32
    %c0_i32_0 = arith.constant 0 : i32
    %c0_i32_1 = arith.constant 0 : i32
    return %c0_i32, %c0_i32_0 : i32, i32
  }
  func.func @transform_12(%arg0: i32) -> (i32, i32) {
    %c0_i32 = arith.constant 0 : i32
    %c0_i32_0 = arith.constant 0 : i32
    %c0_i32_1 = arith.constant 0 : i32
    return %c0_i32, %c0_i32_0 : i32, i32
  }
  func.func @transform_13(%arg0: i32) -> (i32, i32) {
    %c0_i32 = arith.constant 0 : i32
    %c0_i32_0 = arith.constant 0 : i32
    %c0_i32_1 = arith.constant 0 : i32
    return %c0_i32, %c0_i32_0 : i32, i32
  }
  func.func @transform_14(%arg0: i32) -> (i32, i32) {
    %c0_i32 = arith.constant 0 : i32
    %c0_i32_0 = arith.constant 0 : i32
    %c0_i32_1 = arith.constant 0 : i32
    return %c0_i32, %c0_i32_0 : i32, i32
  }
  func.func @transform_15(%arg0: i32) -> (i32, i32) {
    %c0_i32 = arith.constant 0 : i32
    %c0_i32_0 = arith.constant 0 : i32
    %c0_i32_1 = arith.constant 0 : i32
    return %c0_i32, %c0_i32_0 : i32, i32
  }
  func.func @transform_16(%arg0: i32) -> (i32, i32) {
    %c0_i32 = arith.constant 0 : i32
    %c0_i32_0 = arith.constant 0 : i32
    %c0_i32_1 = arith.constant 0 : i32
    return %c0_i32, %c0_i32_0 : i32, i32
  }
  func.func @transform_17(%arg0: i32) -> (i32, i32) {
    %c0_i32 = arith.constant 0 : i32
    %c0_i32_0 = arith.constant 0 : i32
    %c0_i32_1 = arith.constant 0 : i32
    return %c0_i32, %c0_i32_0 : i32, i32
  }
  func.func @transform_18(%arg0: i32) -> (i32, i32) {
    %c0_i32 = arith.constant 0 : i32
    %c0_i32_0 = arith.constant 0 : i32
    %c0_i32_1 = arith.constant 0 : i32
    return %c0_i32, %c0_i32_0 : i32, i32
  }
  func.func @transform_19(%arg0: i32) -> (i32, i32) {
    %c0_i32 = arith.constant 0 : i32
    %c0_i32_0 = arith.constant 0 : i32
    %c0_i32_1 = arith.constant 0 : i32
    return %c0_i32, %c0_i32_0 : i32, i32
  }
  func.func @transform_20(%arg0: i32) -> (i32, i32) {
    %c0_i32 = arith.constant 0 : i32
    %c0_i32_0 = arith.constant 0 : i32
    return %arg0, %c0_i32 : i32, i32
  }
  func.func @transform_21(%arg0: i32) -> (i32, i32) {
    %c0_i32 = arith.constant 0 : i32
    %c0_i32_0 = arith.constant 0 : i32
    return %arg0, %c0_i32 : i32, i32
  }
}

</mosaic_0001>

<bundles_post_ra>
// kernel: tpu_custom_call.1
= control target key start
LH: loop header
LB: loop body
LE: loop exit
PB: predicated region body
PF: predicated region fallthrough
CT: control target
= control target key end

     0   :  { %s3775_s0 = inlined_call_operand.vmem [shape: bf16[48,80], index: 0, kind: input, shape index: {}]   ;;  %s3776_s1 = inlined_call_operand.vmem [shape: bf16[48,10], index: 1, kind: input, shape index: {}]   ;;  %s3777_s2 = inlined_call_operand.vmem [shape: f32[48,137], index: 2, kind: input, shape index: {}]   ;;  %s3778_s3 = inlined_call_operand.vmem [shape: bf16[80,256], index: 3, kind: input, shape index: {}]   ;;  %s3779_s4 = inlined_call_operand.vmem [shape: f32[1,256], index: 4, kind: input, shape index: {}]   ;;  %s3780_s5 = inlined_call_operand.hbm [shape: bf16[256,512], index: 5, kind: input, shape index: {}]   ;;  %s3781_s6 = inlined_call_operand.vmem [shape: f32[1,512], index: 6, kind: input, shape index: {}]   ;;  %s3782_s7 = inlined_call_operand.vmem [shape: bf16[10,32], index: 7, kind: input, shape index: {}]   ;;  %s3783_s8 = inlined_call_operand.vmem [shape: f32[1,32], index: 8, kind: input, shape index: {}]   ;;  %s3784_s9 = inlined_call_operand.vmem [shape: bf16[32,256], index: 9, kind: input, shape index: {}]   ;;  %s3785_s10 = inlined_call_operand.vmem [shape: f32[1,256], index: 10, kind: input, shape index: {}]   ;;  %s3786_s11 = inlined_call_operand.vmem [shape: bf16[256,8], index: 11, kind: input, shape index: {}]   ;;  %s3787_s12 = inlined_call_operand.vmem [shape: bf16[8,256], index: 12, kind: input, shape index: {}]   ;;  %s3788_s13 = inlined_call_operand.vmem [shape: bf16[256,32], index: 13, kind: input, shape index: {}]   ;;  %s3789_s14 = inlined_call_operand.vmem [shape: bf16[32,96], index: 14, kind: input, shape index: {}]   ;;  %s3790_s15 = inlined_call_operand.vmem [shape: bf16[32,96], index: 15, kind: input, shape index: {}]   ;;  %s3791_s16 = inlined_call_operand.vmem [shape: f32[32,96], index: 16, kind: input, shape index: {}]   ;;  %s3792_s17 = inlined_call_operand.vmem [shape: f32[1,96], index: 17, kind: input, shape index: {}]   ;;  %s3793_s18 = inlined_call_operand.vmem [shape: bf16[32,16], index: 18, kind: input, shape index: {}]   ;;  %s3794_s19 = inlined_call_operand.vmem [shape: f32[1,16], index: 19, kind: input, shape index: {}]   ;;  %s3795_s20 = inlined_call_operand.vmem [shape: f32[48,32], index: 20, kind: output, shape index: {0}]   ;;  %s3796_s21 = inlined_call_operand.vmem [shape: f32[48,16], index: 21, kind: output, shape index: {1}]  }
   0x1   :  { %3802 = sst [smem:[#allocation5_spill]] %s3775_s0 }
   0x2   :  { %3803 = sst [smem:[#allocation6_spill]] %s3776_s1 }
   0x3   :  { %3804 = sst [smem:[#allocation7_spill]] %s3777_s2 }
   0x4   :  { %3805 = sst [smem:[#allocation8_spill]] %s3778_s3 }
   0x5   :  { %3806 = sst [smem:[#allocation9_spill]] %s3779_s4 }
   0x6   :  { %3807 = sst [smem:[#allocation10_spill]] %s3780_s5 }
   0x7   :  { %3808 = sst [smem:[#allocation11_spill]] %s3792_s17 }
   0x8   :  { %27 = vsyncpa [#allocation3], 0  ;;  %s2928_s2 = smov [#allocation2]   ;;  %s3809_s3 = sld [smem:[#allocation10_spill]] }
   0x9   :  { %s43_s25 = sshll.u32 %s2928_s2, 4  ;;  %s44_s25 = int_to_ptr.vmem [resolvable:$true] %s43_s25 }
   0xe   :  { %s2904_s28 = scalar_lea.hbm %s3809_s3, 8192 }
   0xf   :  { %p2905_p0 = scmp.ne.s32.totalorder %s3809_s3, %s2904_s28  ;;  %p2908_p1 = scmp.lt.u32.totalorder %s2904_s28, %s3809_s3 }
  0x11   :  { %p2910_p2 = pnand %p2908_p1, %p2905_p0 }
  0x13   :  { %2913 = shalt.err (!%p2910_p2)
}
  0x14   :  { %s2914_s30 = scalar_lea.vmem %s44_s25, 8192  ;;  %p2919_p4 = scmp.lt.s32.totalorder %s44_s25, %s44_s25 }
  0x15   :  { %p2915_p3 = scmp.ne.s32.totalorder %s44_s25, %s2914_s30  ;;  %p2920_p5 = scmp.lt.s32.totalorder %s2914_s30, %s2914_s30 }
  0x17   :  { %p2921_p6 = por %p2920_p5, %p2919_p4 }
  0x19   :  { %p2922_p7 = pnand %p2921_p6, %p2915_p3 }
  0x1b   :  { %2925 = shalt.err (!%p2922_p7)
}
  0x1c   :  { %s2929_s5 = smov 256   ;;  %s2930_s22 = smov 16  }
  0x1d   :  { %49 = dma.hbm_to_vmem [thread:$0]  %s3809_s3, 8192, %s44_s25, [#allocation3], %s2929_s5, %s2929_s5, %s2930_s22  }
  0x1e   :  { %2926 = dma.done.wait [#allocation3], 8192  }
  0x1f   :  { %2927 = vsyncadd [#allocation3], 4294959104  ;;  %v2931_v0 = vmov 0   ;;  %s3810_s2 = sld [smem:[#allocation8_spill]]  ;;  %v2698_v8 = vld [vmem:[#allocation2 + $0x4] ss:$16 sps:$4 sm:$0xff]  }
  0x20   :  { %235 = vmatprep.mubr.bf16.mxu0 %v2931_v0  ;;  %v2700_v9 = vld [vmem:[#allocation2] ss:$16 sps:$4 sm:$0xff]   ;;  %690 = vmatprep.subr.bf16.mxu1 %v2698_v8  ;;  %v2704_v12 = vld [vmem:[#allocation2 + $0x24] ss:$16 sps:$4 sm:$0xff]   ;;  %v2703_v16 = vld [vmem:[#allocation2 + $0xc] ss:$16 sps:$4 sm:$0xff]  }
  0x21   :  { %691 = vmatpush1.bf16.msra.mxu1 %v2700_v9  ;;  %v2706_v13 = vld [vmem:[#allocation2 + $0x20] ss:$16 sps:$4 sm:$0xff]   ;;  %v2710_v15 = vld [vmem:[#allocation2 + $0x44] ss:$16 sps:$4 sm:$0xff]   ;;  %s3811_s3 = sld [smem:[#allocation5_spill]]  ;;  %vm193_vm0 = vcmask 654336  }
  0x22   :  { %692 = vmatprep.subr.bf16.mxu1 %v2704_v12  ;;  %v2712_v17 = vld [vmem:[#allocation2 + $0x40] ss:$16 sps:$4 sm:$0xff]   ;;  %v2716_v19 = vld [vmem:[#allocation2 + $0x64] ss:$16 sps:$4 sm:$0xff]   ;;  %v2701_v20 = vld [vmem:[#allocation2 + $0x8] ss:$16 sps:$4 sm:$0xff]  }
  0x23   :  { %v2709_v21 = vld [vmem:[#allocation2 + $0x2c] ss:$16 sps:$4 sm:$0xff]   ;;  %v2718_v22 = vld [vmem:[#allocation2 + $0x60] ss:$16 sps:$4 sm:$0xff]   ;;  %v2722_v23 = vld [vmem:[#allocation2 + $0x84] ss:$16 sps:$4 sm:$0xff]  }
  0x24   :  { %v2707_v24 = vld [vmem:[#allocation2 + $0x28] ss:$16 sps:$4 sm:$0xff]   ;;  %v2715_v25 = vld [vmem:[#allocation2 + $0x4c] ss:$16 sps:$4 sm:$0xff]   ;;  %v2724_v26 = vld [vmem:[#allocation2 + $0x80] ss:$16 sps:$4 sm:$0xff]  }
  0x25   :  { %v2680_v1 = vld [vmem:[%s3810_s2 + $0x4] ss:$8 sps:$4 sm:$0xff]   ;;  %v2682_v2 = vld [vmem:[%s3810_s2] ss:$8 sps:$4 sm:$0xff]   ;;  %v2683_v3 = vld [vmem:[%s3810_s2 + $0x14] ss:$8 sps:$4 sm:$0xff]   ;;  %693 = vmatpush1.bf16.msra.mxu1 %v2706_v13 }
  0x26   :  { %203 = vmatprep.subr.bf16.mxu0 %v2680_v1  ;;  %v2685_v4 = vld [vmem:[%s3810_s2 + $0x10] ss:$8 sps:$4 sm:$0xff]   ;;  %v2686_v5 = vld [vmem:[%s3810_s2 + $0x24] ss:$8 sps:$4 sm:$0xff]   ;;  %v2688_v6 = vld [vmem:[%s3810_s2 + $0x20] ss:$8 sps:$4 sm:$0xff]   ;;  %694 = vmatprep.subr.bf16.mxu1 %v2710_v15 }
  0x27   :  { %204 = vmatpush1.bf16.msra.mxu0 %v2682_v2  ;;  %v2689_v7 = vld [vmem:[%s3810_s2 + $0x34] ss:$8 sps:$4 sm:$0xff]   ;;  %v2691_v10 = vld [vmem:[%s3810_s2 + $0x30] ss:$8 sps:$4 sm:$0xff]   ;;  %v2692_v11 = vld [vmem:[%s3810_s2 + $0x44] ss:$8 sps:$4 sm:$0xff]  }
  0x28   :  { %205 = vmatprep.subr.bf16.mxu0 %v2683_v3  ;;  %v2694_v14 = vld [vmem:[%s3810_s2 + $0x40] ss:$8 sps:$4 sm:$0xff]   ;;  %v2728_v28 = vld [vmem:[#allocation2 + $0xa4] ss:$16 sps:$4 sm:$0xff]   ;;  %v2721_v30 = vld [vmem:[#allocation2 + $0x6c] ss:$16 sps:$4 sm:$0xff]  }
  0x29   :  { %v2695_v18 = vld [vmem:[%s3811_s3] sm:$0xff]   ;;  %695 = vmatpush1.bf16.msra.mxu1 %v2712_v17  ;;  %v2696_v27 = vld [vmem:[%s3811_s3 + $0x8] sm:$0xff]   ;;  %v2697_v36 = vld [vmem:[%s3811_s3 + $0x10] sm:$0xff]   ;;  %v2932_v15 = vmov 0.0   ;;  %s3812_s23 = sld [smem:[#allocation9_spill]]  ;;  %vm873_vm1 = vcmask 1044480  }
  0x2a   :  { %696 = vmatprep.subr.bf16.mxu1 %v2716_v19  ;;  %v2713_v29 = vld [vmem:[#allocation2 + $0x48] ss:$16 sps:$4 sm:$0xff]   ;;  %v2730_v31 = vld [vmem:[#allocation2 + $0xa0] ss:$16 sps:$4 sm:$0xff]   ;;  %v2734_v32 = vld [vmem:[#allocation2 + $0xc4] ss:$16 sps:$4 sm:$0xff]  }
  0x2b   :  { %206 = vmatpush1.bf16.msra.mxu0 %v2685_v4  ;;  %v2719_v33 = vld [vmem:[#allocation2 + $0x68] ss:$16 sps:$4 sm:$0xff]   ;;  %v2727_v34 = vld [vmem:[#allocation2 + $0x8c] ss:$16 sps:$4 sm:$0xff]   ;;  %v2736_v35 = vld [vmem:[#allocation2 + $0xc0] ss:$16 sps:$4 sm:$0xff]  }
  0x2c   :  { %207 = vmatprep.subr.bf16.mxu0 %v2686_v5  ;;  %v2740_v37 = vld [vmem:[#allocation2 + $0xe4] ss:$16 sps:$4 sm:$0xff]   ;;  %v2725_v38 = vld [vmem:[#allocation2 + $0x88] ss:$16 sps:$4 sm:$0xff]   ;;  %v2733_v39 = vld [vmem:[#allocation2 + $0xac] ss:$16 sps:$4 sm:$0xff]  }
  0x2d   :  { %697 = vmatpush1.bf16.msra.mxu1 %v2718_v22  ;;  %v2742_v40 = vld [vmem:[#allocation2 + $0xe0] ss:$16 sps:$4 sm:$0xff]   ;;  %v2746_v41 = vld [vmem:[#allocation2 + $0x104] ss:$16 sps:$4 sm:$0xff]   ;;  %v2731_v42 = vld [vmem:[#allocation2 + $0xa8] ss:$16 sps:$4 sm:$0xff]  }
  0x2e   :  { %698 = vmatprep.subr.bf16.mxu1 %v2722_v23  ;;  %v2739_v43 = vld [vmem:[#allocation2 + $0xcc] ss:$16 sps:$4 sm:$0xff]   ;;  %v2748_v44 = vld [vmem:[#allocation2 + $0x100] ss:$16 sps:$4 sm:$0xff]   ;;  %v2752_v45 = vld [vmem:[#allocation2 + $0x124] ss:$16 sps:$4 sm:$0xff]  }
  0x2f   :  { %208 = vmatpush1.bf16.msra.mxu0 %v2688_v6  ;;  %v2737_v46 = vld [vmem:[#allocation2 + $0xc8] ss:$16 sps:$4 sm:$0xff]   ;;  %v2745_v47 = vld [vmem:[#allocation2 + $0xec] ss:$16 sps:$4 sm:$0xff]   ;;  %v2754_v49 = vld [vmem:[#allocation2 + $0x120] ss:$16 sps:$4 sm:$0xff]  }
  0x30   :  { %209 = vmatprep.subr.bf16.mxu0 %v2689_v7  ;;  %v2743_v48 = vld [vmem:[#allocation2 + $0xe8] ss:$16 sps:$4 sm:$0xff]   ;;  %v2751_v50 = vld [vmem:[#allocation2 + $0x10c] ss:$16 sps:$4 sm:$0xff]   ;;  %v2758_v51 = vld [vmem:[#allocation2 + $0x144] ss:$16 sps:$4 sm:$0xff]  }
  0x31   :  { %699 = vmatpush1.bf16.msra.mxu1 %v2724_v26  ;;  %v2760_v52 = vld [vmem:[#allocation2 + $0x140] ss:$16 sps:$4 sm:$0xff]   ;;  %v2764_v53 = vld [vmem:[#allocation2 + $0x164] ss:$16 sps:$4 sm:$0xff]   ;;  %v2749_v54 = vld [vmem:[#allocation2 + $0x108] ss:$16 sps:$4 sm:$0xff]  }
  0x32   :  { %700 = vmatprep.subr.bf16.mxu1 %v2728_v28  ;;  %v2757_v55 = vld [vmem:[#allocation2 + $0x12c] ss:$16 sps:$4 sm:$0xff]   ;;  %v2766_v56 = vld [vmem:[#allocation2 + $0x160] ss:$16 sps:$4 sm:$0xff]   ;;  %v2770_v57 = vld [vmem:[#allocation2 + $0x184] ss:$16 sps:$4 sm:$0xff]  }
  0x33   :  { %210 = vmatpush1.bf16.msra.mxu0 %v2691_v10  ;;  %v2755_v58 = vld [vmem:[#allocation2 + $0x128] ss:$16 sps:$4 sm:$0xff]   ;;  %v2763_v59 = vld [vmem:[#allocation2 + $0x14c] ss:$16 sps:$4 sm:$0xff]   ;;  %v2772_v60 = vld [vmem:[#allocation2 + $0x180] ss:$16 sps:$4 sm:$0xff]  }
  0x34   :  { %211 = vmatprep.subr.bf16.mxu0 %v2692_v11  ;;  %v2776_v61 = vld [vmem:[#allocation2 + $0x1a4] ss:$16 sps:$4 sm:$0xff]   ;;  %v2761_v62 = vld [vmem:[#allocation2 + $0x148] ss:$16 sps:$4 sm:$0xff]   ;;  %v2769_v63 = vld [vmem:[#allocation2 + $0x16c] ss:$16 sps:$4 sm:$0xff]  }
  0x35   :  { %701 = vmatpush1.bf16.msra.mxu1 %v2730_v31  ;;  %v2778_v1 = vld [vmem:[#allocation2 + $0x1a0] ss:$16 sps:$4 sm:$0xff]   ;;  %v2767_v2 = vld [vmem:[#allocation2 + $0x168] ss:$16 sps:$4 sm:$0xff]   ;;  %v2775_v3 = vld [vmem:[#allocation2 + $0x18c] ss:$16 sps:$4 sm:$0xff]  }
  0x36   :  { %702 = vmatprep.subr.bf16.mxu1 %v2734_v32  ;;  %v2773_v4 = vld [vmem:[#allocation2 + $0x188] ss:$16 sps:$4 sm:$0xff]   ;;  %v2781_v5 = vld [vmem:[#allocation2 + $0x1ac] ss:$16 sps:$4 sm:$0xff]   ;;  %v2782_v7 = vld [vmem:[#allocation2 + $0x1c4] ss:$16 sps:$4 sm:$0xff]  }
  0x37   :  { %212 = vmatpush1.bf16.msra.mxu0 %v2694_v14  ;;  %v2779_v6 = vld [vmem:[#allocation2 + $0x1a8] ss:$16 sps:$4 sm:$0xff]   ;;  %v2787_v8 = vld [vmem:[#allocation2 + $0x1cc] ss:$16 sps:$4 sm:$0xff]   ;;  %v2784_v9 = vld [vmem:[#allocation2 + $0x1c0] ss:$16 sps:$4 sm:$0xff]  }
  0x38   :  { %753 = vmatprep.subr.bf16.mxu0 %v2703_v16  ;;  %v2785_v10 = vld [vmem:[#allocation2 + $0x1c8] ss:$16 sps:$4 sm:$0xff]   ;;  %v2788_v11 = vld [vmem:[#allocation2 + $0x1e4] ss:$16 sps:$4 sm:$0xff]   ;;  %v2793_v12 = vld [vmem:[#allocation2 + $0x1ec] ss:$16 sps:$4 sm:$0xff]   ;;  %v118_v16 = vlaneseq }
  0x39   :  { %703 = vmatpush1.bf16.msra.mxu1 %v2736_v35  ;;  %v2790_v13 = vld [vmem:[#allocation2 + $0x1e0] ss:$16 sps:$4 sm:$0xff]   ;;  %v2791_v14 = vld [vmem:[#allocation2 + $0x1e8] ss:$16 sps:$4 sm:$0xff]   ;;  %vm2933_vm2 = vmmov 0   ;;  %s3813_s26 = sld [smem:[#allocation6_spill]] }
  0x3a   :  { %2331 = vmatmul.mubr.msk.bf16.vlgmr.msra.gmra.mrb[0].mxu0 %vm193_vm0, %v2695_v18  ;;  %704 = vmatprep.subr.bf16.mxu1 %v2740_v37  ;;  %v3106_v17 = vshrl.u32 %v118_v16, 7  ;;  %v116_v19 = vld [vmem:[%s3812_s23] sm:$0x3]  ;;  %vm863_vm3 = vcmask 80896   ;;  %v2808_v16 = vld [vmem:[%s3786_s11 + $0x50] sm:$0xff]   ;;  %vm979_vm4 = vcmask 261120  }
  0x3b   :  { %245 = vmatprep.mubr.bf16.mxu0 %v2931_v0  ;;  %754 = vmatpush1.bf16.msra.mxu0 %v2701_v20  ;;  %vm1261_vm6 = vcmask 64512   ;;  %vm1376_vm12 = vcmask 1043456   ;;  %s2934_s3 = smov 96   ;;  %s2937_s27 = smov 32  }
  0x3c   :  { %755 = vmatprep.subr.bf16.mxu0 %v2709_v21  ;;  %v3109_v18 = vsub.s32 0, %v3106_v17  ;;  %v3115_v20 = vsub.s32 1, %v3106_v17 }
  0x3d   :  { %705 = vmatpush1.bf16.msra.mxu1 %v2742_v40 }
  0x3e   :  { %706 = vmatprep.subr.bf16.mxu1 %v2746_v41  ;;  %v121_v21 = vrot.slane %v116_v19, %v3109_v18  ;;  %v125_v22 = vrot.slane %v116_v19, %v3115_v20  ;;  %v2809_v19 = vld [vmem:[%s3786_s11 + $0x10] sm:$0xff]  }
  0x3f   :  { %756 = vmatpush1.bf16.msra.mxu0 %v2707_v24 }
  0x40   :  { %757 = vmatprep.subr.bf16.mxu0 %v2715_v25 }
  0x41   :  { %707 = vmatpush1.bf16.msra.mxu1 %v2748_v44 }
  0x42   :  { %2332 = vmatmul.mubr.msk.bf16.gmra.mrb[4].mxu0 %vm193_vm0, %v2696_v27  ;;  %708 = vmatprep.subr.bf16.mxu1 %v2752_v45 }
  0x43   :  { %255 = vmatprep.mubr.bf16.mxu0 %v2931_v0  ;;  %758 = vmatpush1.bf16.msra.mxu0 %v2713_v29 }
  0x44   :  { %759 = vmatprep.subr.bf16.mxu0 %v2721_v30 }
  0x45   :  { %709 = vmatpush1.bf16.msra.mxu1 %v2754_v49 }
  0x46   :  { %710 = vmatprep.subr.bf16.mxu1 %v2758_v51 }
  0x47   :  { %760 = vmatpush1.bf16.msra.mxu0 %v2719_v33  ;;  %v2794_v33 = vld [vmem:[%s3782_s7] sm:$0x1f]  }
  0x48   :  { %761 = vmatprep.subr.bf16.mxu0 %v2727_v34  ;;  %v875_v41 = vsel %vm873_vm1, %v2794_v33, 0 }
  0x49   :  { %711 = vmatpush1.bf16.msra.mxu1 %v2760_v52 }
  0x4a   :  { %2333 = vmatmul.mubr.msk.bf16.gmra.mrb[8].mxu0 %vm193_vm0, %v2697_v36  ;;  %712 = vmatprep.subr.bf16.mxu1 %v2764_v53 }
  0x4b   :  { %762 = vmatpush1.bf16.msra.mxu0 %v2725_v38 }
  0x4c   :  { %763 = vmatprep.subr.bf16.mxu0 %v2733_v39 }
  0x4d   :  { %713 = vmatpush1.bf16.msra.mxu1 %v2766_v56 }
  0x4e   :  { %714 = vmatprep.subr.bf16.mxu1 %v2770_v57 }
  0x4f   :  { %764 = vmatpush1.bf16.msra.mxu0 %v2731_v42 }
  0x50   :  { %765 = vmatprep.subr.bf16.mxu0 %v2739_v43 }
  0x51   :  { %715 = vmatpush1.bf16.msra.mxu1 %v2772_v60 }
  0x52   :  { %716 = vmatprep.subr.bf16.mxu1 %v2776_v61 }
  0x53   :  { %766 = vmatpush1.bf16.msra.mxu0 %v2737_v46 }
  0x54   :  { %767 = vmatprep.subr.bf16.mxu0 %v2745_v47 }
  0x55   :  { %717 = vmatpush1.bf16.msra.mxu1 %v2778_v1 }
  0x56   :  { %718 = vmatprep.subr.bf16.mxu1 %v2782_v7  ;;  %v2798_v7 = vld [vmem:[%s3784_s9] ss:$8 sps:$4 sm:$0xff]  }
  0x57   :  { %768 = vmatpush1.bf16.msra.mxu0 %v2743_v48 }
  0x58   :  { %769 = vmatprep.subr.bf16.mxu0 %v2751_v50 }
  0x59   :  { %719 = vmatpush1.bf16.msra.mxu1 %v2784_v9  ;;  %v2801_v9 = vld [vmem:[%s3784_s9 + $0x10] ss:$8 sps:$4 sm:$0xff]  }
  0x5a   :  { %720 = vmatprep.subr.bf16.mxu1 %v2788_v11  ;;  %v2804_v11 = vld [vmem:[%s3786_s11 + $0x40] sm:$0xff]  }
  0x5b   :  { %770 = vmatpush1.bf16.msra.mxu0 %v2749_v54 }
  0x5c   :  { %771 = vmatprep.subr.bf16.mxu0 %v2757_v55 }
  0x5d   :  { %721 = vmatpush1.bf16.msra.mxu1 %v2790_v13  ;;  %v2806_v13 = vld [vmem:[%s3786_s11 + $0x48] sm:$0xff]  }
  0x5e   :  { %2577 = vmatprep.subr.bf16.mxu1 %v2932_v15 }
  0x5f   :  { %772 = vmatpush1.bf16.msra.mxu0 %v2755_v58 }
  0x60   :  { %773 = vmatprep.subr.bf16.mxu0 %v2763_v59 }
  0x63   :  { %774 = vmatpush1.bf16.msra.mxu0 %v2761_v62 }
  0x64   :  { %775 = vmatprep.subr.bf16.mxu0 %v2769_v63 }
  0x67   :  { %776 = vmatpush1.bf16.msra.mxu0 %v2767_v2 }
  0x68   :  { %777 = vmatprep.subr.bf16.mxu0 %v2775_v3 }
  0x6b   :  { %778 = vmatpush1.bf16.msra.mxu0 %v2773_v4  ;;  %v2795_v4 = vld [vmem:[%s3813_s26] sm:$0xff]  }
  0x6c   :  { %779 = vmatprep.subr.bf16.mxu0 %v2781_v5  ;;  %v2796_v5 = vld [vmem:[%s3813_s26 + $0x8] sm:$0xff]  }
  0x6f   :  { %780 = vmatpush1.bf16.msra.mxu0 %v2779_v6  ;;  %v2797_v6 = vld [vmem:[%s3813_s26 + $0x10] sm:$0xff]  }
  0x70   :  { %781 = vmatprep.subr.bf16.mxu0 %v2787_v8  ;;  %v2800_v8 = vld [vmem:[%s3784_s9 + $0x4] ss:$8 sps:$4 sm:$0xff]  }
  0x73   :  { %782 = vmatpush1.bf16.msra.mxu0 %v2785_v10  ;;  %v2803_v10 = vld [vmem:[%s3784_s9 + $0x14] ss:$8 sps:$4 sm:$0xff]  }
  0x74   :  { %783 = vmatprep.subr.bf16.mxu0 %v2793_v12  ;;  %v2805_v12 = vld [vmem:[%s3786_s11] sm:$0xff]  }
  0x77   :  { %784 = vmatpush1.bf16.msra.mxu0 %v2791_v14  ;;  %v2807_v14 = vld [vmem:[%s3786_s11 + $0x8] sm:$0xff]  }
  0x78   :  { %989 = vmatprep.subr.bf16.mxu0 %v2800_v8 }
 0x10d   :  { %v237_v23 = vpop.f32.mrb[0].mxu0 }
 0x10e   :  { %v238_v24 = vadd.f32 %v237_v23, %v121_v21  ;;  %v239_v25 = vpop.f32.mrb[1].mxu0  ;;  %v2812_v23 = vld [vmem:[%s3786_s11 + $0x60] sm:$0xff]  }
 0x10f   :  { %v240_v26 = vadd.f32 %v239_v25, %v125_v22  ;;  %v241_v27 = vpop.f32.mrb[2].mxu0  ;;  %v2814_v25 = vld [vmem:[%s3786_s11 + $0x68] sm:$0xff]  }
 0x110   :  { %v242_v28 = vadd.f32 %v241_v27, %v121_v21  ;;  %v243_v29 = vpop.f32.mrb[3].mxu0  ;;  %v266_v31 = vmax.f32 %v238_v24, 0.0  ;;  %v2813_v24 = vld [vmem:[%s3786_s11 + $0x20] sm:$0xff]  }
 0x111   :  { %v244_v30 = vadd.f32 %v243_v29, %v125_v22  ;;  %v267_v34 = vmax.f32 %v240_v26, 0.0 }
 0x112   :  { %v268_v32 = vmax.f32 %v242_v28, 0.0 }
 0x113   :  { %v269_v35 = vmax.f32 %v244_v30, 0.0 }
 0x114   :  { %v342_v36 = vpack.c.bf16 %v268_v32, %v266_v31 }
 0x115   :  { %v247_v37 = vpop.f32.mrb[4].mxu0  ;;  %v343_v38 = vpack.c.bf16 %v269_v35, %v267_v34 }
 0x116   :  { %v248_v39 = vadd.f32 %v247_v37, %v121_v21  ;;  %v249_v40 = vpop.f32.mrb[5].mxu0 }
 0x117   :  { %v250_v42 = vadd.f32 %v249_v40, %v125_v22  ;;  %v251_v43 = vpop.f32.mrb[6].mxu0  ;;  %722 = vmatprep.mubr.bf16.mxu1 %v343_v38  ;;  %785 = vmatprep.mubr.bf16.mxu0 %v343_v38 }
 0x118   :  { %v252_v44 = vadd.f32 %v251_v43, %v121_v21  ;;  %v253_v45 = vpop.f32.mrb[7].mxu0  ;;  %723 = vmatmul.mubr.bf16.vlgmr.msra.gmra.mrb[0].mxu1 %v342_v36  ;;  %786 = vmatmul.mubr.bf16.vlgmr.msra.gmra.mrb[12].mxu0 %v342_v36  ;;  %v270_v47 = vmax.f32 %v248_v39, 0.0 }
 0x119   :  { %v254_v46 = vadd.f32 %v253_v45, %v125_v22  ;;  %2578 = vmatpush3.bf16.msra.mxu1 %v875_v41  ;;  %v271_v49 = vmax.f32 %v250_v42, 0.0  ;;  %990 = vmatpush1.bf16.msra.mxu0 %v2798_v7 }
 0x11a   :  { %v272_v48 = vmax.f32 %v252_v44, 0.0  ;;  %991 = vmatprep.subr.bf16.mxu0 %v2803_v10  ;;  %2484 = vmatprep.subr.bf16.mxu1 %v2804_v11 }
 0x11b   :  { %v273_v50 = vmax.f32 %v254_v46, 0.0 }
 0x11c   :  { %v344_v51 = vpack.c.bf16 %v272_v48, %v270_v47 }
 0x11d   :  { %v345_v52 = vpack.c.bf16 %v273_v50, %v271_v49  ;;  %v257_v53 = vpop.f32.mrb[8].mxu0  ;;  %992 = vmatpush1.bf16.msra.mxu0 %v2801_v9  ;;  %v2398_v50 = vld [vmem:[%s3783_s8] ss:$0 sm:$0xff] }
 0x11e   :  { %v258_v54 = vadd.f32 %v257_v53, %v121_v21  ;;  %v259_v55 = vpop.f32.mrb[9].mxu0 }
 0x11f   :  { %v260_v56 = vadd.f32 %v259_v55, %v125_v22  ;;  %v261_v57 = vpop.f32.mrb[10].mxu0  ;;  %732 = vmatprep.mubr.bf16.mxu1 %v345_v52  ;;  %795 = vmatprep.mubr.bf16.mxu0 %v345_v52 }
 0x120   :  { %v262_v58 = vadd.f32 %v261_v57, %v121_v21  ;;  %v263_v59 = vpop.f32.mrb[11].mxu0  ;;  %733 = vmatmul.mubr.bf16.gmra.mrb[4].mxu1 %v344_v51  ;;  %796 = vmatmul.mubr.bf16.gmra.mrb[16].mxu0 %v344_v51  ;;  %v274_v61 = vmax.f32 %v258_v54, 0.0  ;;  %v2810_v21 = vld [vmem:[%s3786_s11 + $0x58] sm:$0xff]  }
 0x121   :  { %v264_v60 = vadd.f32 %v263_v59, %v125_v22  ;;  %v275_v63 = vmax.f32 %v260_v56, 0.0  ;;  %v2811_v22 = vld [vmem:[%s3786_s11 + $0x18] sm:$0xff]  }
 0x122   :  { %v276_v62 = vmax.f32 %v262_v58, 0.0 }
 0x123   :  { %v277_v1 = vmax.f32 %v264_v60, 0.0 }
 0x124   :  { %v346_v2 = vpack.c.bf16 %v276_v62, %v274_v61 }
 0x125   :  { %v347_v3 = vpack.c.bf16 %v277_v1, %v275_v63 }
 0x127   :  { %742 = vmatprep.mubr.bf16.mxu1 %v347_v3  ;;  %805 = vmatprep.mubr.bf16.mxu0 %v347_v3 }
 0x128   :  { %743 = vmatmul.mubr.bf16.gmra.mrb[8].mxu1 %v346_v2  ;;  %806 = vmatmul.mubr.bf16.gmra.mrb[20].mxu0 %v346_v2 }
 0x129   :  { %2579 = vmatprep.mubr.msk.bf16.mxu1 %vm2933_vm2, %v2932_v15  ;;  %1021 = vmatprep.mubr.bf16.mxu0 %v2931_v0 }
 0x130   :  { %2580 = vmatmul.mubr.msk.bf16.vlgmr.msra.gmra.mrb[12].mxu1 %vm863_vm3, %v2795_v4 }
 0x131   :  { %2583 = vmatprep.mubr.msk.bf16.mxu1 %vm2933_vm2, %v2932_v15  ;;  %2485 = vmatpush3.bf16.msra.mxu1 %v2805_v12 }
 0x132   :  { %2486 = vmatprep.subr.bf16.mxu1 %v2806_v13 }
 0x135   :  { %2487 = vmatpush3.bf16.msra.mxu1 %v2807_v14 }
 0x136   :  { %2488 = vmatprep.subr.bf16.mxu1 %v2808_v16  ;;  %v2815_v16 = vld [vmem:[%s3786_s11 + $0x28] sm:$0xff]  }
 0x138   :  { %2584 = vmatmul.mubr.msk.bf16.gmra.mrb[16].mxu1 %vm863_vm3, %v2796_v5 }
 0x139   :  { %2587 = vmatprep.mubr.msk.bf16.mxu1 %vm2933_vm2, %v2932_v15  ;;  %2489 = vmatpush3.bf16.msra.mxu1 %v2809_v19  ;;  %v2816_v19 = vld [vmem:[%s3786_s11 + $0x70] sm:$0xff]  }
 0x13a   :  { %2490 = vmatprep.subr.bf16.mxu1 %v2810_v21  ;;  %v2817_v21 = vld [vmem:[%s3786_s11 + $0x30] sm:$0xff]  }
 0x13d   :  { %2491 = vmatpush3.bf16.msra.mxu1 %v2811_v22  ;;  %v2818_v22 = vld [vmem:[%s3786_s11 + $0x78] sm:$0xff]  }
 0x13e   :  { %2492 = vmatprep.subr.bf16.mxu1 %v2812_v23  ;;  %v2819_v23 = vld [vmem:[%s3786_s11 + $0x38] sm:$0xff]   ;;  %s3814_s11 = sld [smem:[#allocation7_spill]] }
 0x140   :  { %2588 = vmatmul.mubr.msk.bf16.gmra.mrb[20].mxu1 %vm863_vm3, %v2797_v6 }
 0x141   :  { %2493 = vmatpush3.bf16.msra.mxu1 %v2813_v24  ;;  %v3267_v24 = vld [vmem:[%s3781_s6] sm:$0xf] }
 0x142   :  { %2494 = vmatprep.subr.bf16.mxu1 %v2814_v25  ;;  %v947_v25 = vld [vmem:[%s3785_s10] sm:$0x3] }
 0x145   :  { %2495 = vmatpush3.bf16.msra.mxu1 %v2815_v16 }
 0x146   :  { %2496 = vmatprep.subr.bf16.mxu1 %v2816_v19 }
 0x149   :  { %2497 = vmatpush3.bf16.msra.mxu1 %v2817_v21 }
 0x14a   :  { %2498 = vmatprep.subr.bf16.mxu1 %v2818_v22 }
 0x14d   :  { %2499 = vmatpush3.bf16.msra.mxu1 %v2819_v23 }
 0x1eb   :  { %v3183_v26 = vpop.f32.mrb[0].mxu1  ;;  %v3185_v27 = vpop.f32.mrb[12].mxu0 }
 0x1ec   :  { %v3187_v28 = vpop.f32.mrb[1].mxu1  ;;  %v3189_v29 = vpop.f32.mrb[13].mxu0 }
 0x1ed   :  { %v3191_v30 = vpop.f32.mrb[2].mxu1  ;;  %v3193_v31 = vpop.f32.mrb[14].mxu0 }
 0x1ee   :  { %v3195_v32 = vpop.f32.mrb[3].mxu1  ;;  %v3197_v33 = vpop.f32.mrb[15].mxu0 }
 0x1f3   :  { %v3199_v34 = vpop.f32.mrb[4].mxu1  ;;  %v3201_v35 = vpop.f32.mrb[16].mxu0 }
 0x1f4   :  { %v3203_v36 = vpop.f32.mrb[5].mxu1  ;;  %v3205_v37 = vpop.f32.mrb[17].mxu0 }
 0x1f5   :  { %v3207_v38 = vpop.f32.mrb[6].mxu1  ;;  %v3209_v39 = vpop.f32.mrb[18].mxu0 }
 0x1f6   :  { %v3211_v40 = vpop.f32.mrb[7].mxu1  ;;  %v3213_v41 = vpop.f32.mrb[19].mxu0 }
 0x1fb   :  { %v3215_v42 = vpop.f32.mrb[8].mxu1  ;;  %v3217_v43 = vpop.f32.mrb[20].mxu0 }
 0x1fc   :  { %v3219_v44 = vpop.f32.mrb[9].mxu1  ;;  %v3221_v45 = vpop.f32.mrb[21].mxu0 }
 0x1fd   :  { %v3223_v46 = vpop.f32.mrb[10].mxu1  ;;  %v3225_v47 = vpop.f32.mrb[22].mxu0 }
 0x1fe   :  { %v3227_v48 = vpop.f32.mrb[11].mxu1  ;;  %v3229_v49 = vpop.f32.mrb[23].mxu0 }
 0x203   :  { %v911_v51 = vpop.f32.mrb[12].mxu1 }
 0x204   :  { %v912_v52 = vadd.f32 %v2398_v50, %v911_v51  ;;  %v2581_v53 = vpop.f32.mrb[13].mxu1  ;;  %v952_v51 = vrot.slane %v947_v25, %v3109_v18 }
 0x205   :  { %v914_v54 = vpop.f32.mrb[14].mxu1  ;;  %v956_v53 = vrot.slane %v947_v25, %v3115_v20 }
 0x206   :  { %v915_v55 = vadd.f32 %v2398_v50, %v914_v54  ;;  %v2582_v56 = vpop.f32.mrb[15].mxu1  ;;  %v934_v57 = vmax.f32 %v912_v52, 0.0  ;;  %v357_v52 = vrot.slane %v3267_v24, %v3115_v20 }
 0x208   :  { %v935_v58 = vmax.f32 %v915_v55, 0.0  ;;  %v741_v21 = vadd.f32 %v3211_v40, %v357_v52 }
 0x20a   :  { %v3234_v59 = vpack.c.bf16 %v935_v58, %v934_v57  ;;  %v727_v58 = vadd.f32 %v3187_v28, %v357_v52 }
 0x20b   :  { %v919_v60 = vpop.f32.mrb[16].mxu1 }
 0x20c   :  { %v920_v61 = vadd.f32 %v2398_v50, %v919_v60  ;;  %v2585_v62 = vpop.f32.mrb[17].mxu1  ;;  %2410 = vmatmul.mubr.msk.bf16.vlgmr.msra.gmra.mrb[24].mxu0 %vm979_vm4, %v3234_v59 }
 0x20d   :  { %v922_v63 = vpop.f32.mrb[18].mxu1  ;;  %1031 = vmatprep.mubr.bf16.mxu0 %v2931_v0 }
 0x20e   :  { %v923_v1 = vadd.f32 %v2398_v50, %v922_v63  ;;  %v2586_v2 = vpop.f32.mrb[19].mxu1  ;;  %v936_v3 = vmax.f32 %v920_v61, 0.0 }
 0x210   :  { %v937_v4 = vmax.f32 %v923_v1, 0.0 }
 0x212   :  { %v3239_v5 = vpack.c.bf16 %v937_v4, %v936_v3 }
 0x213   :  { %v927_v6 = vpop.f32.mrb[20].mxu1 }
 0x214   :  { %v928_v7 = vadd.f32 %v2398_v50, %v927_v6  ;;  %v2589_v8 = vpop.f32.mrb[21].mxu1  ;;  %2411 = vmatmul.mubr.msk.bf16.gmra.mrb[28].mxu0 %vm979_vm4, %v3239_v5 }
 0x215   :  { %v930_v9 = vpop.f32.mrb[22].mxu1  ;;  %1041 = vmatprep.mubr.bf16.mxu0 %v2931_v0 }
 0x216   :  { %v938_v10 = vmax.f32 %v928_v7, 0.0  ;;  %v931_v11 = vadd.f32 %v2398_v50, %v930_v9  ;;  %v2590_v12 = vpop.f32.mrb[23].mxu1  ;;  %v353_v50 = vrot.slane %v3267_v24, %v3109_v18  ;;  %v731_v18 = vadd.f32 %v3195_v32, %v357_v52 }
 0x218   :  { %v939_v13 = vmax.f32 %v931_v11, 0.0  ;;  %v725_v55 = vadd.f32 %v3183_v26, %v353_v50  ;;  %v729_v62 = vadd.f32 %v3191_v30, %v353_v50  ;;  %v735_v9 = vadd.f32 %v3199_v34, %v353_v50 }
 0x219   :  { %v737_v11 = vadd.f32 %v3203_v36, %v357_v52  ;;  %v745_v36 = vadd.f32 %v3215_v42, %v353_v50 }
 0x21a   :  { %v3244_v14 = vpack.c.bf16 %v939_v13, %v938_v10  ;;  %v739_v13 = vadd.f32 %v3207_v38, %v353_v50 }
 0x21c   :  { %2412 = vmatmul.mubr.msk.bf16.gmra.mrb[32].mxu0 %vm979_vm4, %v3244_v14 }
 0x21d   :  { %1415 = vmatprep.mubr.bf16.mxu0 %v2931_v0 }
 0x2df   :  { %v1023_v54 = vpop.f32.mrb[24].mxu0 }
 0x2e0   :  { %v1024_v56 = vadd.f32 %v1023_v54, %v952_v51  ;;  %v1025_v57 = vpop.f32.mrb[25].mxu0 }
 0x2e1   :  { %v1026_v60 = vadd.f32 %v1025_v57, %v956_v53  ;;  %v1027_v61 = vpop.f32.mrb[26].mxu0 }
 0x2e2   :  { %v1052_v63 = vmul.f32 %v1024_v56, %v725_v55  ;;  %v1028_v1 = vadd.f32 %v1027_v61, %v952_v51  ;;  %v1029_v2 = vpop.f32.mrb[27].mxu0 }
 0x2e3   :  { %v1053_v3 = vmul.f32 %v1026_v60, %v727_v58  ;;  %v1030_v4 = vadd.f32 %v1029_v2, %v956_v53  ;;  %v747_v60 = vadd.f32 %v3219_v44, %v357_v52  ;;  %v751_v2 = vadd.f32 %v3227_v48, %v357_v52  ;;  %v3293_v44 = vld [vmem:[%s3814_s11 + $0x8] sm:$0xff] }
 0x2e4   :  { %v1054_v6 = vmul.f32 %v1028_v1, %v729_v62  ;;  %v749_v62 = vadd.f32 %v3223_v46, %v353_v50  ;;  %v3298_v50 = vld [vmem:[%s3814_s11 + $0x18] sm:$0xff]  ;;  %vm94_vm5 = vcmp.ne.f32.partialorder %v3293_v44, 0.0 }
 0x2e5   :  { %v1055_v20 = vmul.f32 %v1030_v4, %v731_v18  ;;  %vm95_vm7 = vcmp.ne.f32.partialorder %v3298_v50, 0.0 }
 0x2e6   :  { %v1096_v7 = vpack.c.bf16 %v1054_v6, %v1052_v63 }
 0x2e7   :  { %v1033_v8 = vpop.f32.mrb[28].mxu0  ;;  %v1097_v26 = vpack.c.bf16 %v1055_v20, %v1053_v3 }
 0x2e8   :  { %v1034_v10 = vadd.f32 %v1033_v8, %v952_v51  ;;  %v1035_v28 = vpop.f32.mrb[29].mxu0 }
 0x2e9   :  { %v1036_v12 = vadd.f32 %v1035_v28, %v956_v53  ;;  %v1037_v30 = vpop.f32.mrb[30].mxu0  ;;  %1230 = vmatprep.mubr.bf16.mxu1 %v1097_v26 }
 0x2ea   :  { %v1056_v16 = vmul.f32 %v1034_v10, %v735_v9  ;;  %v1038_v32 = vadd.f32 %v1037_v30, %v952_v51  ;;  %v1039_v19 = vpop.f32.mrb[31].mxu0  ;;  %1231 = vmatmul.mubr.bf16.vlgmr.msra.gmra.mrb[24].mxu1 %v1096_v7  ;;  %v3310_v10 = vld [vmem:[%s3814_s11 + $0x28] sm:$0xff] }
 0x2eb   :  { %v1057_v22 = vmul.f32 %v1036_v12, %v737_v11  ;;  %v1040_v23 = vadd.f32 %v1039_v19, %v956_v53  ;;  %v3315_v11 = vld [vmem:[%s3814_s11 + $0x38] sm:$0xff]  ;;  %vm96_vm8 = vcmp.ne.f32.partialorder %v3310_v10, 0.0 }
 0x2ec   :  { %v1058_v25 = vmul.f32 %v1038_v32, %v739_v13  ;;  %vm97_vm9 = vcmp.ne.f32.partialorder %v3315_v11, 0.0 }
 0x2ed   :  { %v1059_v54 = vmul.f32 %v1040_v23, %v741_v21  ;;  %v2132_v50 = vsel %vm97_vm9, 1, %v2931_v0 }
 0x2ee   :  { %v1098_v34 = vpack.c.bf16 %v1058_v25, %v1056_v16  ;;  %v3328_v25 = vld [vmem:[%s3814_s11 + $0x48] sm:$0xff] }
 0x2ef   :  { %v1043_v55 = vpop.f32.mrb[32].mxu0  ;;  %v1099_v56 = vpack.c.bf16 %v1059_v54, %v1057_v22  ;;  %vm98_vm10 = vcmp.ne.f32.partialorder %v3328_v25, 0.0  ;;  %v2843_v25 = vld [vmem:[%s3793_s18 + $0x8] sm:$0xff]  }
 0x2f0   :  { %v1044_v57 = vadd.f32 %v1043_v55, %v952_v51  ;;  %v1045_v58 = vpop.f32.mrb[33].mxu0 }
 0x2f1   :  { %v1046_v38 = vadd.f32 %v1045_v58, %v956_v53  ;;  %v1047_v61 = vpop.f32.mrb[34].mxu0  ;;  %1238 = vmatprep.mubr.bf16.mxu1 %v1099_v56 }
 0x2f2   :  { %v1060_v63 = vmul.f32 %v1044_v57, %v745_v36  ;;  %v1048_v40 = vadd.f32 %v1047_v61, %v952_v51  ;;  %v1049_v1 = vpop.f32.mrb[35].mxu0  ;;  %1239 = vmatmul.mubr.bf16.gmra.mrb[28].mxu1 %v1098_v34  ;;  %v3333_v34 = vld [vmem:[%s3814_s11 + $0x58] sm:$0xff] }
 0x2f3   :  { %v1061_v18 = vmul.f32 %v1046_v38, %v747_v60  ;;  %v1050_v3 = vadd.f32 %v1049_v1, %v956_v53  ;;  %vm99_vm11 = vcmp.ne.f32.partialorder %v3333_v34, 0.0 }
 0x2f4   :  { %v1062_v4 = vmul.f32 %v1048_v40, %v749_v62  ;;  %v1358_v40 = vld [vmem:[%s3787_s12] sm:$0xff] }
 0x2f5   :  { %v1063_v6 = vmul.f32 %v1050_v3, %v751_v2  ;;  %v2430_v1 = vcombine.high %v1358_v40, %v1358_v40  ;;  %v2429_v2 = vcombine.low %v1358_v40, %v1358_v40 }
 0x2f6   :  { %v1100_v42 = vpack.c.bf16 %v1062_v4, %v1060_v63 }
 0x2f7   :  { %v1101_v20 = vpack.c.bf16 %v1063_v6, %v1061_v18  ;;  %2431 = vmatprep.subr.msk.bf16.mxu0 %vm1376_vm12, %v2430_v1  ;;  %v1378_v18 = vsel %vm1376_vm12, %v2429_v2, 0  ;;  %v2822_v1 = vld [vmem:[%s3788_s13 + $0x40] sm:$0xff]  }
 0x2f8   :  { %1384 = vmatpush1.bf16.msra.mxu0 %v1378_v18  ;;  %v2823_v2 = vld [vmem:[%s3788_s13] sm:$0xff]   ;;  %v2824_v18 = vld [vmem:[%s3788_s13 + $0x48] sm:$0xff]   ;;  %2518 = vmatprep.subr.bf16.mxu1 %v2822_v1 }
 0x2f9   :  { %1246 = vmatprep.mubr.bf16.mxu1 %v1101_v20  ;;  %2591 = vmatprep.subr.bf16.mxu0 %v2932_v15 }
 0x2fa   :  { %1247 = vmatmul.mubr.bf16.gmra.mrb[32].mxu1 %v1100_v42 }
 0x2fb   :  { %2519 = vmatpush3.bf16.msra.mxu1 %v2823_v2 }
 0x2fc   :  { %2520 = vmatprep.subr.bf16.mxu1 %v2824_v18  ;;  %v2834_v18 = vld [vmem:[%s3788_s13 + $0x70] sm:$0xff]  }
 0x3bd   :  { %v2500_v46 = vpop.f32.mrb[24].mxu1 }
 0x3be   :  { %v2501_v48 = vpop.f32.mrb[25].mxu1 }
 0x3bf   :  { %v2502_v51 = vadd.f32 %v2501_v48, %v2500_v46  ;;  %v2503_v52 = vpop.f32.mrb[26].mxu1 }
 0x3c0   :  { %v2504_v53 = vpop.f32.mrb[27].mxu1 }
 0x3c1   :  { %v2505_v7 = vadd.f32 %v2504_v53, %v2503_v52  ;;  %v1255_v8 = vsel %vm94_vm5, -1e+30, %v2502_v51 }
 0x3c2   :  { %v1262_v26 = vsel %vm1261_vm6, %v1255_v8, -inf }
 0x3c3   :  { %1263 = vmax.xlane.f32.xlu0 %v1262_v26  ;;  %v1256_v9 = vsel %vm95_vm7, -1e+30, %v2505_v7 }
 0x3c4   :  { %v1265_v30 = vsel %vm1261_vm6, %v1256_v9, -inf }
 0x3c5   :  { %v2506_v28 = vpop.f32.mrb[28].mxu1 }
 0x3c6   :  { %v2507_v12 = vpop.f32.mrb[29].mxu1 }
 0x3c7   :  { %v2508_v13 = vadd.f32 %v2507_v12, %v2506_v28  ;;  %v2509_v16 = vpop.f32.mrb[30].mxu1  ;;  %1266 = vmax.xlane.f32.xlu0 %v1265_v30 }
 0x3c8   :  { %v2510_v32 = vpop.f32.mrb[31].mxu1 }
 0x3c9   :  { %v2511_v19 = vadd.f32 %v2510_v32, %v2509_v16  ;;  %v1257_v21 = vsel %vm96_vm8, -1e+30, %v2508_v13 }
 0x3ca   :  { %v1268_v22 = vsel %vm1261_vm6, %v1257_v21, -inf }
 0x3cb   :  { %1269 = vmax.xlane.f32.xlu1 %v1268_v22  ;;  %v1258_v23 = vsel %vm97_vm9, -1e+30, %v2511_v19 }
 0x3cc   :  { %v1271_v56 = vsel %vm1261_vm6, %v1258_v23, -inf }
 0x3cd   :  { %v2512_v54 = vpop.f32.mrb[32].mxu1 }
 0x3ce   :  { %v2513_v55 = vpop.f32.mrb[33].mxu1 }
 0x3cf   :  { %v2514_v36 = vadd.f32 %v2513_v55, %v2512_v54  ;;  %v2515_v57 = vpop.f32.mrb[34].mxu1  ;;  %1272 = vmax.xlane.f32.xlu1 %v1271_v56 }
 0x3d0   :  { %v2516_v58 = vpop.f32.mrb[35].mxu1 }
 0x3d1   :  { %v2517_v60 = vadd.f32 %v2516_v58, %v2515_v57  ;;  %v1259_v38 = vsel %vm98_vm10, -1e+30, %v2514_v36 }
 0x3d2   :  { %v1274_v61 = vsel %vm1261_vm6, %v1259_v38, -inf }
 0x3d3   :  { %1275 = vmax.xlane.f32.xlu0 %v1274_v61  ;;  %v1260_v62 = vsel %vm99_vm11, -1e+30, %v2517_v60 }
 0x3d4   :  { %v1277_v63 = vsel %vm1261_vm6, %v1260_v62, -inf }
 0x3d5   :  { %1278 = vmax.xlane.f32.xlu1 %v1277_v63 }
 0x450   :  { %v1264_v3 = vpop.xlane.xlu0 %1263 }
 0x451   :  { %v1280_v4 = vsub.f32 %v1255_v8, %v1264_v3  ;;  %v2825_v3 = vld [vmem:[%s3788_s13 + $0x8] sm:$0xff]  }
 0x452   :  { %2521 = vmatpush3.bf16.msra.mxu1 %v2825_v3  ;;  %v2837_v3 = vld [vmem:[%s3788_s13 + $0x38] sm:$0xff]  }
 0x453   :  { %v1286_v6 = vmul.f32 1.442695, %v1280_v4  ;;  %v2826_v4 = vld [vmem:[%s3788_s13 + $0x50] sm:$0xff]  }
 0x454   :  { %v1267_v42 = vpop.xlane.xlu0 %1266  ;;  %2522 = vmatprep.subr.bf16.mxu1 %v2826_v4  ;;  %v2838_v4 = vld [vmem:[%s3790_s15] sm:$0xff]  }
 0x455   :  { %2844 = vpow2.f32 %v1286_v6  ;;  %v1281_v20 = vsub.f32 %v1256_v9, %v1267_v42  ;;  %v2827_v6 = vld [vmem:[%s3788_s13 + $0x10] sm:$0xff]   ;;  %v2828_v42 = vld [vmem:[%s3788_s13 + $0x58] sm:$0xff]  }
 0x456   :  { %2523 = vmatpush3.bf16.msra.mxu1 %v2827_v6  ;;  %v2839_v6 = vld [vmem:[%s3790_s15 + $0x8] sm:$0xff]   ;;  %s2936_s15 = smov 64  }
 0x457   :  { %v1288_v46 = vmul.f32 1.442695, %v1281_v20  ;;  %v2829_v20 = vld [vmem:[%s3788_s13 + $0x18] sm:$0xff]   ;;  %2524 = vmatprep.subr.bf16.mxu1 %v2828_v42  ;;  %v360_v42 = vsub.s32 2, %v3106_v17 }
 0x458   :  { %v1270_v48 = vpop.xlane.xlu1 %1269 }
 0x459   :  { %2846 = vpow2.f32 %v1288_v46  ;;  %v1282_v51 = vsub.f32 %v1257_v21, %v1270_v48  ;;  %v2830_v46 = vld [vmem:[%s3788_s13 + $0x60] sm:$0xff]  }
 0x45a   :  { %2525 = vmatpush3.bf16.msra.mxu1 %v2829_v20  ;;  %v2831_v48 = vld [vmem:[%s3788_s13 + $0x20] sm:$0xff]   ;;  %v364_v20 = vsub.s32 3, %v3106_v17 }
 0x45b   :  { %v1290_v52 = vmul.f32 1.442695, %v1282_v51  ;;  %2526 = vmatprep.subr.bf16.mxu1 %v2830_v46  ;;  %v2832_v51 = vld [vmem:[%s3788_s13 + $0x68] sm:$0xff]   ;;  %v361_v46 = vrot.slane %v3267_v24, %v360_v42 }
 0x45c   :  { %v1273_v53 = vpop.xlane.xlu1 %1272 }
 0x45d   :  { %2848 = vpow2.f32 %v1290_v52  ;;  %v1283_v7 = vsub.f32 %v1258_v23, %v1273_v53  ;;  %v2833_v52 = vld [vmem:[%s3788_s13 + $0x28] sm:$0xff]  }
 0x45e   :  { %2527 = vmatpush3.bf16.msra.mxu1 %v2831_v48  ;;  %v365_v48 = vrot.slane %v3267_v24, %v364_v20 }
 0x45f   :  { %v2845_v26 = vpop.eup %2844  ;;  %v1292_v28 = vmul.f32 1.442695, %v1283_v7  ;;  %2528 = vmatprep.subr.bf16.mxu1 %v2832_v51  ;;  %v788_v51 = vadd.f32 %v3185_v27, %v361_v46 }
 0x460   :  { %v1276_v12 = vpop.xlane.xlu0 %1275  ;;  %v3350_v30 = vsel %vm94_vm5, 0.0, %v2845_v26  ;;  %v800_v27 = vadd.f32 %v3205_v37, %v365_v48  ;;  %v808_v37 = vadd.f32 %v3217_v43, %v361_v46 }
 0x461   :  { %2850 = vpow2.f32 %v1292_v28  ;;  %v1284_v8 = vsub.f32 %v1259_v38, %v1276_v12  ;;  %v1304_v9 = vsel %vm1261_vm6, %v3350_v30, 0.0 }
 0x462   :  { %v1279_v13 = vpop.xlane.xlu1 %1278  ;;  %1305 = vadd.xlane.f32.xlu0 %v1304_v9  ;;  %2529 = vmatpush3.bf16.msra.mxu1 %v2833_v52  ;;  %v790_v52 = vadd.f32 %v3189_v29, %v365_v48 }
 0x463   :  { %v2847_v16 = vpop.eup %2846  ;;  %v1294_v32 = vmul.f32 1.442695, %v1284_v8  ;;  %v1285_v19 = vsub.f32 %v1260_v62, %v1279_v13  ;;  %2530 = vmatprep.subr.bf16.mxu1 %v2834_v18 }
 0x464   :  { %v1299_v21 = vsel %vm95_vm7, 0.0, %v2847_v16 }
 0x465   :  { %2852 = vpow2.f32 %v1294_v32  ;;  %v1296_v22 = vmul.f32 1.442695, %v1285_v19  ;;  %v1307_v23 = vsel %vm1261_vm6, %v1299_v21, 0.0 }
 0x466   :  { %1308 = vadd.xlane.f32.xlu1 %v1307_v23 }
 0x467   :  { %v2849_v54 = vpop.eup %2848  ;;  %2854 = vpow2.f32 %v1296_v22 }
 0x468   :  { %v1300_v55 = vsel %vm96_vm8, 0.0, %v2849_v54 }
 0x469   :  { %v1310_v56 = vsel %vm1261_vm6, %v1300_v55, 0.0 }
 0x46a   :  { %1311 = vadd.xlane.f32.xlu0 %v1310_v56 }
 0x46b   :  { %v2851_v36 = vpop.eup %2850 }
 0x46c   :  { %v1301_v57 = vsel %vm97_vm9, 0.0, %v2851_v36 }
 0x46d   :  { %v1313_v58 = vsel %vm1261_vm6, %v1301_v57, 0.0 }
 0x46e   :  { %1314 = vadd.xlane.f32.xlu1 %v1313_v58 }
 0x46f   :  { %v2853_v60 = vpop.eup %2852 }
 0x470   :  { %v3365_v38 = vsel %vm98_vm10, 0.0, %v2853_v60 }
 0x471   :  { %v2855_v61 = vpop.eup %2854  ;;  %v1316_v62 = vsel %vm1261_vm6, %v3365_v38, 0.0 }
 0x472   :  { %1317 = vadd.xlane.f32.xlu0 %v1316_v62  ;;  %v3371_v63 = vsel %vm99_vm11, 0.0, %v2855_v61 }
 0x473   :  { %v1319_v40 = vsel %vm1261_vm6, %v3371_v63, 0.0 }
 0x474   :  { %1320 = vadd.xlane.f32.xlu1 %v1319_v40 }
 0x4ef   :  { %v1306_v53 = vpop.xlane.xlu0 %1305 }
 0x4f0   :  { %2856 = vrcp.f32 %v1306_v53  ;;  %vm1322_vm13 = vcmp.gt.f32.partialorder %v1306_v53, 0.0  ;;  %v792_v53 = vadd.f32 %v3193_v31, %v361_v46  ;;  %v802_v31 = vadd.f32 %v3209_v39, %v361_v46 }
 0x4f3   :  { %v1309_v7 = vpop.xlane.xlu1 %1308 }
 0x4f4   :  { %2858 = vrcp.f32 %v1309_v7  ;;  %vm1323_vm14 = vcmp.gt.f32.partialorder %v1309_v7, 0.0  ;;  %v794_v7 = vadd.f32 %v3197_v33, %v365_v48  ;;  %v804_v33 = vadd.f32 %v3213_v41, %v365_v48 }
 0x4f5   :  { %v810_v41 = vadd.f32 %v3221_v45, %v365_v48 }
 0x4f7   :  { %v1312_v26 = vpop.xlane.xlu0 %1311 }
 0x4f8   :  { %2860 = vrcp.f32 %v1312_v26  ;;  %vm1324_vm15 = vcmp.gt.f32.partialorder %v1312_v26, 0.0  ;;  %v816_v26 = vmax.f32 %v788_v51, 0.0 }
 0x4fa   :  { %v2857_v28 = vpop.eup %2856 }
 0x4fb   :  { %v1315_v12 = vpop.xlane.xlu1 %1314  ;;  %v1334_v8 = vmul.f32 %v2857_v28, %v3350_v30  ;;  %v817_v28 = vmax.f32 %v790_v52, 0.0 }
 0x4fc   :  { %2862 = vrcp.f32 %v1315_v12  ;;  %vm1325_vm0 = vcmp.gt.f32.partialorder %v1315_v12, 0.0 }
 0x4fd   :  { %v1352_v32 = vsel %vm1322_vm13, %v1334_v8, 0.0  ;;  %v818_v8 = vmax.f32 %v792_v53, 0.0 }
 0x4fe   :  { %v2859_v9 = vpop.eup %2858 }
 0x4ff   :  { %v1335_v13 = vmul.f32 %v2859_v9, %v1299_v21  ;;  %v1318_v16 = vpop.xlane.xlu0 %1317 }
 0x500   :  { %2864 = vrcp.f32 %v1318_v16  ;;  %vm1326_vm3 = vcmp.gt.f32.partialorder %v1318_v16, 0.0  ;;  %v819_v16 = vmax.f32 %v794_v7, 0.0 }
 0x501   :  { %v1353_v19 = vsel %vm1323_vm14, %v1335_v13, 0.0  ;;  %v1321_v22 = vpop.xlane.xlu1 %1320 }
 0x502   :  { %v2861_v23 = vpop.eup %2860  ;;  %v1359_v54 = vpack.c.bf16 %v1353_v19, %v1352_v32  ;;  %2866 = vrcp.f32 %v1321_v22  ;;  %vm1327_vm1 = vcmp.gt.f32.partialorder %v1321_v22, 0.0  ;;  %v798_v19 = vadd.f32 %v3201_v35, %v361_v46 }
 0x503   :  { %v1336_v56 = vmul.f32 %v2861_v23, %v1300_v55  ;;  %v823_v35 = vmax.f32 %v804_v33, 0.0 }
 0x504   :  { %2432 = vmatmul.mubr.msk.bf16.vlgmr.msra.gmra.mrb[36].mxu0 %vm1261_vm6, %v1359_v54 }
 0x505   :  { %1425 = vmatprep.mubr.bf16.mxu0 %v2931_v0  ;;  %v1354_v30 = vsel %vm1324_vm15, %v1336_v56, 0.0  ;;  %2592 = vmatpush3.bf16.msra.mxu0 %v2838_v4  ;;  %v820_v56 = vmax.f32 %v798_v19, 0.0 }
 0x506   :  { %v2863_v36 = vpop.eup %2862  ;;  %2593 = vmatprep.subr.bf16.mxu0 %v2932_v15 }
 0x507   :  { %v1337_v58 = vmul.f32 %v2863_v36, %v1301_v57  ;;  %v821_v36 = vmax.f32 %v800_v27, 0.0  ;;  %v1840_v27 = vld [vmem:[%s3791_s16 + $0x18] sm:$0xff] }
 0x509   :  { %v1355_v21 = vsel %vm1325_vm0, %v1337_v58, 0.0  ;;  %2594 = vmatpush3.bf16.msra.mxu0 %v2839_v6 }
 0x50a   :  { %v2865_v60 = vpop.eup %2864  ;;  %v1360_v61 = vpack.c.bf16 %v1355_v21, %v1354_v30  ;;  %v822_v30 = vmax.f32 %v802_v31, 0.0 }
 0x50b   :  { %v1338_v40 = vmul.f32 %v2865_v60, %v3365_v38  ;;  %v2835_v38 = vld [vmem:[%s3788_s13 + $0x30] sm:$0xff]  }
 0x50c   :  { %v2867_v62 = vpop.eup %2866  ;;  %2433 = vmatmul.mubr.msk.bf16.gmra.mrb[40].mxu0 %vm1261_vm6, %v1360_v61  ;;  %2531 = vmatpush3.bf16.msra.mxu1 %v2835_v38  ;;  %v824_v38 = vmax.f32 %v808_v37, 0.0 }
 0x50d   :  { %v1339_v1 = vmul.f32 %v2867_v62, %v3371_v63  ;;  %1435 = vmatprep.mubr.bf16.mxu0 %v2931_v0  ;;  %v1356_v2 = vsel %vm1326_vm3, %v1338_v40, 0.0  ;;  %v2836_v63 = vld [vmem:[%s3788_s13 + $0x78] sm:$0xff]   ;;  %s3815_s13 = sld [smem:[#allocation11_spill]] }
 0x50e   :  { %2532 = vmatprep.subr.bf16.mxu1 %v2836_v63  ;;  %v825_v63 = vmax.f32 %v810_v41, 0.0 }
 0x50f   :  { %v1357_v55 = vsel %vm1327_vm1, %v1339_v1, 0.0 }
 0x510   :  { %v1361_v57 = vpack.c.bf16 %v1357_v55, %v1356_v2  ;;  %2533 = vmatpush3.bf16.msra.mxu1 %v2837_v3  ;;  %v812_v55 = vadd.f32 %v3225_v47, %v361_v46 }
 0x511   :  { %2664 = vmatprep.subr.bf16.mxu1 %v2932_v15 }
 0x512   :  { %v826_v43 = vmax.f32 %v812_v55, 0.0 }
 0x514   :  { %2434 = vmatmul.mubr.msk.bf16.gmra.mrb[44].mxu0 %vm1261_vm6, %v1361_v57  ;;  %v814_v57 = vadd.f32 %v3229_v49, %v365_v48  ;;  %v1838_v48 = vld [vmem:[%s3791_s16 + $0x8] sm:$0xff] }
 0x515   :  { %2595 = vmatprep.mubr.msk.bf16.mxu0 %vm2933_vm2, %v2932_v15 }
 0x516   :  { %v827_v20 = vmax.f32 %v814_v57, 0.0 }
 0x5d7   :  { %v1417_v12 = vpop.f32.mrb[36].mxu0 }
 0x5d8   :  { %v1446_v9 = vmul.f32 %v1417_v12, %v816_v26  ;;  %v1419_v13 = vpop.f32.mrb[37].mxu0  ;;  %v3470_v26 = vld [vmem:[%s3814_s11] sm:$0xff] }
 0x5d9   :  { %v1447_v17 = vmul.f32 %v1419_v13, %v817_v28  ;;  %v1421_v32 = vpop.f32.mrb[38].mxu0  ;;  %v3475_v28 = vld [vmem:[%s3814_s11 + $0x10] sm:$0xff]  ;;  %1813 = vrot.lane.b32.xlu0 %v3470_v26, %s2934_s3  ;;  %v3484_v12 = vld [vmem:[%s3814_s11 + $0x20] sm:$0xff] }
 0x5da   :  { %v1448_v24 = vmul.f32 %v1421_v32, %v818_v8  ;;  %v1423_v22 = vpop.f32.mrb[39].mxu0  ;;  %1815 = vrot.lane.b32.xlu1 %v3475_v28, %s2934_s3  ;;  %v3489_v8 = vld [vmem:[%s3814_s11 + $0x40] sm:$0xff]  ;;  %v3505_v13 = vld [vmem:[%s3814_s11 + $0x50] sm:$0xff] }
 0x5db   :  { %v1449_v29 = vmul.f32 %v1423_v22, %v819_v16  ;;  %v1839_v22 = vld [vmem:[%s3791_s16 + $0x10] sm:$0xff] }
 0x5dc   :  { %v1490_v23 = vpack.c.bf16 %v1448_v24, %v1446_v9  ;;  %v3498_v9 = vld [vmem:[%s3814_s11 + $0x30] sm:$0xff] }
 0x5dd   :  { %v1491_v54 = vpack.c.bf16 %v1449_v29, %v1447_v17  ;;  %1821 = vrot.lane.b32.xlu0 %v3489_v8, %s2934_s3 }
 0x5de   :  { %1817 = vrot.lane.b32.xlu1 %v3484_v12, %s2934_s3 }
 0x5df   :  { %v1427_v58 = vpop.f32.mrb[40].mxu0  ;;  %1624 = vmatprep.mubr.bf16.mxu1 %v1491_v54 }
 0x5e0   :  { %v1450_v21 = vmul.f32 %v1427_v58, %v820_v56  ;;  %v1429_v60 = vpop.f32.mrb[41].mxu0  ;;  %1625 = vmatmul.mubr.bf16.vlgmr.msra.gmra.mrb[36].mxu1 %v1490_v23  ;;  %v2660_v23 = vpack.c.bf16 %v1840_v27, %v1839_v22 }
 0x5e1   :  { %v1451_v61 = vmul.f32 %v1429_v60, %v821_v36  ;;  %v1431_v62 = vpop.f32.mrb[42].mxu0  ;;  %2666 = vmatpush3.bf16.msra.mxu1 %v2838_v4 }
 0x5e2   :  { %v1452_v40 = vmul.f32 %v1431_v62, %v822_v30  ;;  %v1433_v39 = vpop.f32.mrb[43].mxu0  ;;  %2665 = vmatprep.subr.bf16.mxu1 %v2932_v15  ;;  %1819 = vrot.lane.b32.xlu1 %v3498_v9, %s2934_s3 }
 0x5e3   :  { %v1453_v1 = vmul.f32 %v1433_v39, %v823_v35  ;;  %v2840_v39 = vld [vmem:[%s3789_s14] sm:$0xff]  }
 0x5e4   :  { %v1492_v2 = vpack.c.bf16 %v1452_v40, %v1450_v21 }
 0x5e5   :  { %v1493_v18 = vpack.c.bf16 %v1453_v1, %v1451_v61  ;;  %2667 = vmatpush3.bf16.msra.mxu1 %v2839_v6  ;;  %v1837_v6 = vld [vmem:[%s3791_s16] sm:$0xff]  ;;  %v2841_v1 = vld [vmem:[%s3789_s14 + $0x8] sm:$0xff]  }
 0x5e6   :  { %2607 = vmatprep.subr.bf16.mxu1 %v2932_v15  ;;  %v2656_v7 = vpack.c.bf16 %v1838_v48, %v1837_v6  ;;  %1823 = vrot.lane.b32.xlu1 %v3505_v13, %s2934_s3 }
 0x5e7   :  { %v1437_v3 = vpop.f32.mrb[44].mxu0  ;;  %1632 = vmatprep.mubr.bf16.mxu1 %v1493_v18 }
 0x5e8   :  { %v1454_v4 = vmul.f32 %v1437_v3, %v824_v38  ;;  %v1439_v42 = vpop.f32.mrb[45].mxu0  ;;  %1633 = vmatmul.mubr.bf16.gmra.mrb[40].mxu1 %v1492_v2  ;;  %2657 = vmatprep.subr.bf16.mxu0 %v2656_v7 }
 0x5e9   :  { %v1455_v45 = vmul.f32 %v1439_v42, %v825_v63  ;;  %v1441_v51 = vpop.f32.mrb[46].mxu0 }
 0x5ea   :  { %v1456_v52 = vmul.f32 %v1441_v51, %v826_v43  ;;  %v1443_v47 = vpop.f32.mrb[47].mxu0  ;;  %v2461_v43 = vld [vmem:[%s3815_s13] ss:$0 sm:$0xff] }
 0x5eb   :  { %v1457_v46 = vmul.f32 %v1443_v47, %v827_v20 }
 0x5ec   :  { %v1494_v53 = vpack.c.bf16 %v1456_v52, %v1454_v4 }
 0x5ed   :  { %v1495_v49 = vpack.c.bf16 %v1457_v46, %v1455_v45 }
 0x5ef   :  { %1640 = vmatprep.mubr.bf16.mxu1 %v1495_v49 }
 0x5f0   :  { %1641 = vmatmul.mubr.bf16.gmra.mrb[44].mxu1 %v1494_v53 }
 0x5f1   :  { %2603 = vmatprep.mubr.msk.bf16.mxu1 %vm2933_vm2, %v2932_v15 }
 0x6b3   :  { %v2534_v16 = vpop.f32.mrb[36].mxu1 }
 0x6b4   :  { %v2535_v17 = vpop.f32.mrb[37].mxu1 }
 0x6b5   :  { %v2536_v32 = vadd.f32 %v2535_v17, %v2534_v16  ;;  %v2537_v19 = vpop.f32.mrb[38].mxu1 }
 0x6b6   :  { %v2538_v24 = vpop.f32.mrb[39].mxu1 }
 0x6b7   :  { %v2539_v29 = vadd.f32 %v2538_v24, %v2537_v19 }
 0x6b9   :  { %v1657_v31 = vpack.c.bf16 %v2539_v29, %v2536_v32 }
 0x6bb   :  { %v2540_v33 = vpop.f32.mrb[40].mxu1  ;;  %2596 = vmatmul.mubr.msk.bf16.vlgmr.msra.gmra.mrb[48].mxu0 %vm979_vm4, %v1657_v31 }
 0x6bc   :  { %2659 = vmatpush3.bf16.msra.mxu0 %v2656_v7  ;;  %v2541_v54 = vpop.f32.mrb[41].mxu1  ;;  %2599 = vmatprep.mubr.msk.bf16.mxu0 %vm2933_vm2, %v2932_v15 }
 0x6bd   :  { %v2542_v56 = vadd.f32 %v2541_v54, %v2540_v33  ;;  %v2543_v36 = vpop.f32.mrb[42].mxu1  ;;  %2661 = vmatprep.subr.bf16.mxu0 %v2660_v23 }
 0x6be   :  { %v2544_v58 = vpop.f32.mrb[43].mxu1 }
 0x6bf   :  { %v2545_v30 = vadd.f32 %v2544_v58, %v2543_v36 }
 0x6c0   :  { %2663 = vmatpush3.bf16.msra.mxu0 %v2660_v23 }
 0x6c1   :  { %v1658_v21 = vpack.c.bf16 %v2545_v30, %v2542_v56  ;;  %2640 = vmatprep.subr.bf16.mxu0 %v2932_v15 }
 0x6c3   :  { %v2546_v60 = vpop.f32.mrb[44].mxu1  ;;  %2600 = vmatmul.mubr.msk.bf16.gmra.mrb[52].mxu0 %vm979_vm4, %v1658_v21 }
 0x6c4   :  { %v2547_v35 = vpop.f32.mrb[45].mxu1  ;;  %2631 = vmatprep.mubr.msk.f32.mxu0 %vm979_vm4, %v3470_v26 }
 0x6c5   :  { %v2548_v61 = vadd.f32 %v2547_v35, %v2546_v60  ;;  %v2549_v62 = vpop.f32.mrb[46].mxu1 }
 0x6c6   :  { %v2550_v37 = vpop.f32.mrb[47].mxu1 }
 0x6c7   :  { %v2551_v40 = vadd.f32 %v2550_v37, %v2549_v62  ;;  %v1816_v62 = vpop.permute.xlu1 %1815 }
 0x6c9   :  { %v1659_v41 = vpack.c.bf16 %v2551_v40, %v2548_v61  ;;  %v1814_v40 = vpop.permute.xlu0 %1813 }
 0x6cb   :  { %2604 = vmatmul.mubr.msk.bf16.vlgmr.msra.gmra.mrb[48].mxu1 %vm979_vm4, %v1659_v41  ;;  %2632 = vmatmul.mubr.msk.f32.vlgmr.msra.gmra.mrb[56].mxu0 %vm979_vm4, %v3475_v28  ;;  %v1818_v37 = vpop.permute.xlu1 %1817 }
 0x6cc   :  { %2608 = vmatpush3.bf16.msra.mxu1 %v2840_v39  ;;  %2634 = vmatprep.mubr.msk.f32.mxu0 %vm979_vm4, %v3484_v12 }
 0x6cd   :  { %2609 = vmatprep.subr.bf16.mxu1 %v2932_v15  ;;  %2611 = vmatprep.mubr.msk.bf16.mxu1 %vm2933_vm2, %v2932_v15 }
 0x6cf   :  { %2635 = vmatmul.mubr.msk.f32.gmra.mrb[58].mxu0 %vm979_vm4, %v3498_v9 }
 0x6d0   :  { %2610 = vmatpush3.bf16.msra.mxu1 %v2841_v1  ;;  %2637 = vmatprep.mubr.msk.f32.mxu0 %vm979_vm4, %v3489_v8  ;;  %v1820_v1 = vpop.permute.xlu1 %1819 }
 0x6d3   :  { %2612 = vmatmul.mubr.msk.bf16.vlgmr.msra.gmra.mrb[52].mxu1 %vm979_vm4, %v3234_v59  ;;  %2638 = vmatmul.mubr.msk.f32.gmra.mrb[60].mxu0 %vm979_vm4, %v3505_v13 }
 0x6d4   :  { %2615 = vmatprep.mubr.msk.bf16.mxu1 %vm2933_vm2, %v2932_v15  ;;  %2644 = vmatprep.mubr.msk.bf16.mxu0 %vm2933_vm2, %v2932_v15 }
 0x6db   :  { %2616 = vmatmul.mubr.msk.bf16.gmra.mrb[56].mxu1 %vm979_vm4, %v3239_v5 }
 0x6dc   :  { %2619 = vmatprep.mubr.msk.bf16.mxu1 %vm2933_vm2, %v2932_v15 }
 0x6e3   :  { %2620 = vmatmul.mubr.msk.bf16.gmra.mrb[60].mxu1 %vm979_vm4, %v3244_v14  ;;  %v2935_v14 = vmov 8  }
 0x6e4   :  { %2679 = vset.pattern.permute.xlu1 %v2935_v14  ;;  %2678 = vset.pattern.permute.xlu0 %v2935_v14 }
 0x78e   :  { %v1715_v55 = vpop.f32.mrb[48].mxu0 }
 0x78f   :  { %v2597_v59 = vpop.f32.mrb[49].mxu0 }
 0x790   :  { %v1718_v2 = vpop.f32.mrb[50].mxu0 }
 0x791   :  { %v2598_v57 = vpop.f32.mrb[51].mxu0 }
 0x796   :  { %v1723_v18 = vpop.f32.mrb[52].mxu0 }
 0x797   :  { %v2601_v38 = vpop.f32.mrb[53].mxu0 }
 0x798   :  { %v1726_v63 = vpop.f32.mrb[54].mxu0  ;;  %v1822_v38 = vpop.permute.xlu0 %1821 }
 0x799   :  { %v2602_v3 = vpop.f32.mrb[55].mxu0 }
 0x79e   :  { %v1731_v4 = vpop.f32.mrb[48].mxu1  ;;  %v2633_v5 = vpop.f32.mrb[56].mxu0 }
 0x79f   :  { %v1932_v42 = vadd.f32 %v2633_v5, %v2461_v43  ;;  %v2605_v20 = vpop.f32.mrb[49].mxu1  ;;  %v1926_v45 = vpop.f32.mrb[57].mxu0 }
 0x7a0   :  { %v1927_v51 = vadd.f32 %v2461_v43, %v1926_v45  ;;  %v1734_v52 = vpop.f32.mrb[50].mxu1 }
 0x7a1   :  { %v2606_v47 = vpop.f32.mrb[51].mxu1  ;;  %2005 = vrot.lane.b32.xlu1 %v1932_v42, %s2936_s15 }
 0x7a2   :  { %v2636_v46 = vpop.f32.mrb[58].mxu0  ;;  %2003 = vrot.lane.b32.xlu0 %v1927_v51, %s2936_s15 }
 0x7a3   :  { %v1942_v53 = vadd.f32 %v2636_v46, %v2461_v43  ;;  %v1936_v49 = vpop.f32.mrb[59].mxu0 }
 0x7a4   :  { %v1937_v6 = vadd.f32 %v2461_v43, %v1936_v49 }
 0x7a5   :  { %2009 = vrot.lane.b32.xlu1 %v1942_v53, %s2936_s15 }
 0x7a6   :  { %v1784_v48 = vpop.f32.mrb[52].mxu1  ;;  %v2639_v7 = vpop.f32.mrb[60].mxu0  ;;  %2007 = vrot.lane.b32.xlu0 %v1937_v6, %s2936_s15 }
 0x7a7   :  { %v1785_v16 = vadd.f32 %v1784_v48, %v1715_v55  ;;  %v1952_v17 = vadd.f32 %v2639_v7, %v2461_v43  ;;  %v2613_v32 = vpop.f32.mrb[53].mxu1  ;;  %v1946_v19 = vpop.f32.mrb[61].mxu0 }
 0x7a8   :  { %v1947_v24 = vadd.f32 %v2461_v43, %v1946_v19  ;;  %v1787_v22 = vpop.f32.mrb[54].mxu1 }
 0x7a9   :  { %v1788_v27 = vadd.f32 %v1787_v22, %v1718_v2  ;;  %v2614_v29 = vpop.f32.mrb[55].mxu1  ;;  %2013 = vrot.lane.b32.xlu1 %v1952_v17, %s2936_s15  ;;  %v3565_v41 = vadd.f32 %v1814_v40, %v1785_v16 }
 0x7aa   :  { %2011 = vrot.lane.b32.xlu0 %v1947_v24, %s2936_s15 }
 0x7ab   :  { %v3563_v39 = vadd.f32 %v1816_v62, %v1788_v27  ;;  %v1955_v2 = vadd.f32 %v1927_v51, %v3565_v41 }
 0x7ad   :  { %v1956_v55 = vadd.f32 %v1932_v42, %v3563_v39 }
 0x7ae   :  { %v1792_v31 = vpop.f32.mrb[56].mxu1 }
 0x7af   :  { %v1793_v23 = vadd.f32 %v1792_v31, %v1723_v18  ;;  %v2617_v33 = vpop.f32.mrb[57].mxu1  ;;  %v1824_v18 = vpop.permute.xlu1 %1823 }
 0x7b0   :  { %v1795_v54 = vpop.f32.mrb[58].mxu1 }
 0x7b1   :  { %v1796_v56 = vadd.f32 %v1795_v54, %v1726_v63  ;;  %v2618_v36 = vpop.f32.mrb[59].mxu1  ;;  %v3571_v57 = vadd.f32 %v1818_v37, %v1793_v23  ;;  %v2469_v63 = vmul.f32 -1.442695, %v1956_v55  ;;  %v2130_v55 = vsel %vm95_vm7, 1, %v2931_v0 }
 0x7b3   :  { %v3568_v59 = vadd.f32 %v1820_v1, %v1796_v56  ;;  %v1957_v5 = vadd.f32 %v1937_v6, %v3571_v57  ;;  %2868 = vpow2.f32 %v2469_v63 }
 0x7b5   :  { %v1958_v3 = vadd.f32 %v1942_v53, %v3568_v59  ;;  %v2470_v51 = vmul.f32 -1.442695, %v1957_v5 }
 0x7b6   :  { %v1800_v58 = vpop.f32.mrb[60].mxu1 }
 0x7b7   :  { %v1801_v30 = vadd.f32 %v1800_v58, %v1731_v4  ;;  %v2621_v21 = vpop.f32.mrb[61].mxu1  ;;  %v2468_v4 = vmul.f32 -1.442695, %v1955_v2  ;;  %v2471_v42 = vmul.f32 -1.442695, %v1958_v3  ;;  %v2129_v2 = vsel %vm94_vm5, 1, %v2931_v0 }
 0x7b8   :  { %v1803_v60 = vpop.f32.mrb[62].mxu1 }
 0x7b9   :  { %v1804_v35 = vadd.f32 %v1803_v60, %v1734_v52  ;;  %v2622_v61 = vpop.f32.mrb[63].mxu1  ;;  %v3577_v20 = vadd.f32 %v1822_v38, %v1801_v30  ;;  %2870 = vpow2.f32 %v2468_v4 }
 0x7ba   :  { %2872 = vpow2.f32 %v2471_v42 }
 0x7bb   :  { %v3574_v43 = vadd.f32 %v1824_v18, %v1804_v35  ;;  %v1959_v52 = vadd.f32 %v1947_v24, %v3577_v20  ;;  %2874 = vpow2.f32 %v2470_v51  ;;  %v2131_v18 = vsel %vm96_vm8, 1, %v2931_v0 }
 0x7bd   :  { %v1960_v45 = vadd.f32 %v1952_v17, %v3574_v43  ;;  %v2472_v47 = vmul.f32 -1.442695, %v1959_v52  ;;  %v2869_v46 = vpop.eup %2868 }
 0x7be   :  { %v1980_v49 = vadd.f32 1.0, %v2869_v46 }
 0x7bf   :  { %v2473_v14 = vmul.f32 -1.442695, %v1960_v45 }
 0x7c1   :  { %2876 = vpow2.f32 %v2473_v14 }
 0x7c2   :  { %2878 = vpow2.f32 %v2472_v47 }
 0x7c3   :  { %v2871_v53 = vpop.eup %2870  ;;  %2880 = vrcp.f32 %v1980_v49 }
 0x7c4   :  { %v2873_v6 = vpop.eup %2872  ;;  %v1979_v48 = vadd.f32 1.0, %v2871_v53 }
 0x7c5   :  { %v2875_v7 = vpop.eup %2874  ;;  %v1982_v16 = vadd.f32 1.0, %v2873_v6 }
 0x7c6   :  { %2882 = vrcp.f32 %v1979_v48  ;;  %v1981_v17 = vadd.f32 1.0, %v2875_v7 }
 0x7c7   :  { %2884 = vrcp.f32 %v1982_v16 }
 0x7c8   :  { %2886 = vrcp.f32 %v1981_v17 }
 0x7cb   :  { %v2877_v32 = vpop.eup %2876 }
 0x7cc   :  { %v2879_v19 = vpop.eup %2878  ;;  %v1984_v24 = vadd.f32 1.0, %v2877_v32 }
 0x7cd   :  { %v1983_v22 = vadd.f32 1.0, %v2879_v19  ;;  %v3581_v27 = vpop.eup %2880 }
 0x7ce   :  { %2888 = vrcp.f32 %v1984_v24  ;;  %v2064_v53 = vsub.f32 1.0, %v3581_v27 }
 0x7cf   :  { %2890 = vrcp.f32 %v1983_v22 }
 0x7d0   :  { %v3583_v31 = vpop.eup %2882 }
 0x7d1   :  { %v3588_v56 = vpop.eup %2884  ;;  %v2063_v6 = vsub.f32 1.0, %v3583_v31 }
 0x7d2   :  { %v3591_v58 = vpop.eup %2886 }
 0x7d8   :  { %v3596_v35 = vpop.eup %2888 }
 0x7d9   :  { %v3599_v62 = vpop.eup %2890 }
 0x813   :  { %v2006_v29 = vpop.permute.xlu1 %2005 }
 0x814   :  { %v2022_v23 = vmul.f32 %v3581_v27, %v2006_v29  ;;  %v2004_v33 = vpop.permute.xlu0 %2003 }
 0x815   :  { %v2021_v54 = vmul.f32 %v3583_v31, %v2004_v33 }
 0x816   :  { %2035 = vrot.lane.b32.xlu1 %v2022_v23, %s2936_s15 }
 0x817   :  { %v2010_v36 = vpop.permute.xlu1 %2009  ;;  %2033 = vrot.lane.b32.xlu0 %v2021_v54, %s2936_s15 }
 0x818   :  { %v2024_v30 = vmul.f32 %v3588_v56, %v2010_v36  ;;  %v2008_v21 = vpop.permute.xlu0 %2007  ;;  %v2065_v36 = vsub.f32 1.0, %v3591_v58 }
 0x819   :  { %v2023_v60 = vmul.f32 %v3591_v58, %v2008_v21 }
 0x81a   :  { %2039 = vrot.lane.b32.xlu1 %v2024_v30, %s2936_s15 }
 0x81b   :  { %v2014_v61 = vpop.permute.xlu1 %2013  ;;  %2037 = vrot.lane.b32.xlu0 %v2023_v60, %s2936_s15 }
 0x81c   :  { %v2026_v37 = vmul.f32 %v3596_v35, %v2014_v61  ;;  %v2012_v40 = vpop.permute.xlu0 %2011 }
 0x81d   :  { %v2025_v1 = vmul.f32 %v3599_v62, %v2012_v40 }
 0x81e   :  { %2043 = vrot.lane.b32.xlu1 %v2026_v37, %s2936_s15 }
 0x81f   :  { %2041 = vrot.lane.b32.xlu0 %v2025_v1, %s2936_s15 }
 0x822   :  { %2139 = vperm.xlu1 %2679, %v2130_v55  }
 0x823   :  { %2136 = vperm.xlu0 %2678, %v2129_v2  }
 0x826   :  { %2099 = vrot.lane.b32.xlu1 %v3470_v26, %s2937_s27 }
 0x827   :  { %2101 = vrot.lane.b32.xlu0 %v3475_v28, %s2937_s27 }
 0x82a   :  { %2142 = vperm.xlu1 %2679, %v2131_v18  }
 0x82b   :  { %2145 = vperm.xlu0 %2678, %v2132_v50  }
 0x82e   :  { %2103 = vrot.lane.b32.xlu1 %v3484_v12, %s2937_s27 }
 0x82f   :  { %2105 = vrot.lane.b32.xlu0 %v3498_v9, %s2937_s27 }
 0x888   :  { %v2036_v44 = vpop.permute.xlu1 %2035 }
 0x889   :  { %v2052_v26 = vadd.f32 %v2036_v44, %v3563_v39  ;;  %v2034_v28 = vpop.permute.xlu0 %2033 }
 0x88a   :  { %v2051_v38 = vadd.f32 %v2034_v28, %v3565_v41  ;;  %v2134_v41 = vsel %vm99_vm11, 1, %v2931_v0 }
 0x88b   :  { %2892 = vtanh.f32 %v2052_v26 }
 0x88c   :  { %2894 = vtanh.f32 %v2051_v38  ;;  %v2040_v10 = vpop.permute.xlu1 %2039 }
 0x88d   :  { %v2038_v63 = vpop.permute.xlu0 %2037  ;;  %v2054_v11 = vadd.f32 %v2040_v10, %v3568_v59  ;;  %v2133_v59 = vsel %vm98_vm10, 1, %v2931_v0  ;;  %v2842_v0 = vld [vmem:[%s3793_s18] sm:$0xff]  }
 0x88e   :  { %v2053_v3 = vadd.f32 %v2038_v63, %v3571_v57  ;;  %2641 = vmatpush3.bf16.msra.mxu0 %v2842_v0 }
 0x88f   :  { %2896 = vtanh.f32 %v2054_v11  ;;  %2642 = vmatprep.subr.bf16.mxu0 %v2932_v15 }
 0x890   :  { %v2044_v4 = vpop.permute.xlu1 %2043  ;;  %2898 = vtanh.f32 %v2053_v3 }
 0x891   :  { %v2042_v5 = vpop.permute.xlu0 %2041  ;;  %v2056_v12 = vadd.f32 %v2044_v4, %v3574_v43 }
 0x892   :  { %v2055_v9 = vadd.f32 %v2042_v5, %v3577_v20  ;;  %2643 = vmatpush3.bf16.msra.mxu0 %v2843_v25 }
 0x893   :  { %2900 = vtanh.f32 %v2056_v12 }
 0x894   :  { %2902 = vtanh.f32 %v2055_v9 }
 0x895   :  { %v2893_v39 = vpop.eup %2892 }
 0x896   :  { %v2895_v42 = vpop.eup %2894  ;;  %2077 = vrot.lane.b32.xlu0 %v2893_v39, %s2934_s3 }
 0x897   :  { %2075 = vrot.lane.b32.xlu1 %v2895_v42, %s2934_s3 }
 0x899   :  { %v2897_v57 = vpop.eup %2896 }
 0x89a   :  { %2151 = vperm.xlu0 %2678, %v2134_v41   ;;  %v2899_v43 = vpop.eup %2898 }
 0x89b   :  { %2148 = vperm.xlu1 %2679, %v2133_v59  }
 0x89d   :  { %v2901_v20 = vpop.eup %2900 }
 0x89e   :  { %2081 = vrot.lane.b32.xlu0 %v2897_v57, %s2934_s3  ;;  %v2903_v45 = vpop.eup %2902 }
 0x89f   :  { %2079 = vrot.lane.b32.xlu1 %v2899_v43, %s2934_s3 }
 0x8a1   :  { %v3656_v51 = vpop.permute.xlu1 %2139 }
 0x8a2   :  { %2085 = vrot.lane.b32.xlu0 %v2901_v20, %s2934_s3  ;;  %v3654_v34 = vpop.permute.xlu0 %2136  ;;  %vm2154_vm5 = vcmp.eq.s32.totalorder %v3656_v51, 1  ;;  %v2474_v20 = vld [vmem:[%s3794_s19] ss:$0 sm:$0xff] }
 0x8a3   :  { %2083 = vrot.lane.b32.xlu1 %v2903_v45, %s2934_s3  ;;  %vm2153_vm6 = vcmp.eq.s32.totalorder %v3654_v34, 1 }
 0x8a5   :  { %v2100_v52 = vpop.permute.xlu1 %2099 }
 0x8a6   :  { %2109 = vrot.lane.b32.xlu0 %v3505_v13, %s2937_s27  ;;  %v2102_v13 = vpop.permute.xlu0 %2101  ;;  %v2117_v32 = vmul.f32 %v3583_v31, %v2100_v52  ;;  %v2066_v31 = vsub.f32 1.0, %v3588_v56 }
 0x8a7   :  { %2107 = vrot.lane.b32.xlu1 %v3489_v8, %s2937_s27  ;;  %v2118_v48 = vmul.f32 %v3581_v27, %v2102_v13 }
 0x8a9   :  { %v3660_v8 = vpop.permute.xlu1 %2142 }
 0x8aa   :  { %v3658_v14 = vpop.permute.xlu0 %2145  ;;  %vm2155_vm8 = vcmp.eq.s32.totalorder %v3660_v8, 1 }
 0x8ab   :  { %vm2156_vm7 = vcmp.eq.s32.totalorder %v3658_v14, 1 }
 0x8ad   :  { %v2104_v46 = vpop.permute.xlu1 %2103 }
 0x8ae   :  { %v2106_v47 = vpop.permute.xlu0 %2105  ;;  %v2119_v61 = vmul.f32 %v3591_v58, %v2104_v46  ;;  %v2067_v58 = vsub.f32 1.0, %v3599_v62 }
 0x8af   :  { %v2120_v30 = vmul.f32 %v3588_v56, %v2106_v47  ;;  %v2068_v56 = vsub.f32 1.0, %v3596_v35 }
 0x908   :  { %v2078_v49 = vpop.permute.xlu0 %2077 }
 0x909   :  { %v2094_v7 = vmul.f32 %v2078_v49, %v2064_v53  ;;  %v2076_v16 = vpop.permute.xlu1 %2075 }
 0x90a   :  { %v2093_v17 = vmul.f32 %v2076_v16, %v2063_v6 }
 0x90b   :  { %v2124_v19 = vadd.f32 %v2118_v48, %v2094_v7 }
 0x90c   :  { %v2123_v24 = vadd.f32 %v2117_v32, %v2093_v17 }
 0x90d   :  { %v2160_v22 = vsel %vm2154_vm5, 0.0, %v2124_v19 }
 0x90e   :  { %v2159_v29 = vsel %vm2153_vm6, 0.0, %v2123_v24 }
 0x90f   :  { %v2169_v23 = vpack.c.bf16 %v2160_v22, %v2159_v29 }
 0x911   :  { %2182 = vrot.lane.b32.xlu1 %v2169_v23, %s2934_s3 }
 0x919   :  { %v3673_v27 = vpop.permute.xlu0 %2151 }
 0x91a   :  { %v3675_v33 = vpop.permute.xlu1 %2148  ;;  %vm2158_vm9 = vcmp.eq.s32.totalorder %v3673_v27, 1 }
 0x91b   :  { %vm2157_vm10 = vcmp.eq.s32.totalorder %v3675_v33, 1 }
 0x91d   :  { %v2082_v54 = vpop.permute.xlu0 %2081 }
 0x91e   :  { %v2096_v21 = vmul.f32 %v2082_v54, %v2066_v31  ;;  %v2080_v60 = vpop.permute.xlu1 %2079 }
 0x91f   :  { %v2095_v37 = vmul.f32 %v2080_v60, %v2065_v36 }
 0x920   :  { %v2126_v40 = vadd.f32 %v2120_v30, %v2096_v21 }
 0x921   :  { %v2125_v1 = vadd.f32 %v2119_v61, %v2095_v37  ;;  %v2086_v55 = vpop.permute.xlu0 %2085 }
 0x922   :  { %v2162_v2 = vsel %vm2156_vm7, 0.0, %v2126_v40  ;;  %v2084_v18 = vpop.permute.xlu1 %2083  ;;  %v2098_v28 = vmul.f32 %v2086_v55, %v2068_v56 }
 0x923   :  { %v2161_v50 = vsel %vm2155_vm8, 0.0, %v2125_v1  ;;  %v2097_v63 = vmul.f32 %v2084_v18, %v2067_v58 }
 0x924   :  { %v2170_v44 = vpack.c.bf16 %v2162_v2, %v2161_v50 }
 0x925   :  { %v2110_v26 = vpop.permute.xlu0 %2109 }
 0x926   :  { %v2122_v38 = vmul.f32 %v3596_v35, %v2110_v26  ;;  %v2108_v10 = vpop.permute.xlu1 %2107  ;;  %2184 = vrot.lane.b32.xlu0 %v2170_v44, %s2934_s3 }
 0x927   :  { %v2121_v11 = vmul.f32 %v3599_v62, %v2108_v10 }
 0x928   :  { %v2128_v3 = vadd.f32 %v2122_v38, %v2098_v28 }
 0x929   :  { %v2127_v4 = vadd.f32 %v2121_v11, %v2097_v63 }
 0x92a   :  { %v2164_v5 = vsel %vm2158_vm9, 0.0, %v2128_v3  ;;  %2278 = vrot.lane.b32.xlu0 %v2159_v29, %s2934_s3 }
 0x92b   :  { %v2163_v35 = vsel %vm2157_vm10, 0.0, %v2127_v4 }
 0x92c   :  { %v2171_v12 = vpack.c.bf16 %v2164_v5, %v2163_v35 }
 0x92e   :  { %2282 = vrot.lane.b32.xlu0 %v2161_v50, %s2934_s3  ;;  %2186 = vrot.lane.b32.xlu1 %v2171_v12, %s2934_s3 }
 0x932   :  { %2286 = vrot.lane.b32.xlu0 %v2163_v35, %s2934_s3  ;;  %2280 = vrot.lane.b32.xlu1 %v2160_v22, %s2934_s3 }
 0x936   :  { %2284 = vrot.lane.b32.xlu1 %v2162_v2, %s2934_s3 }
 0x93a   :  { %2288 = vrot.lane.b32.xlu1 %v2164_v5, %s2934_s3 }
 0x983   :  { %v2183_v62 = vpop.permute.xlu1 %2182 }
 0x984   :  { %2645 = vmatmul.mubr.msk.bf16.vlgmr.msra.gmra.mrb[64].mxu0 %vm979_vm4, %v2183_v62 }
 0x985   :  { %2648 = vmatprep.mubr.msk.bf16.mxu0 %vm2933_vm2, %v2932_v15 }
 0x998   :  { %v2185_v9 = vpop.permute.xlu0 %2184 }
 0x999   :  { %2649 = vmatmul.mubr.msk.bf16.gmra.mrb[68].mxu0 %vm979_vm4, %v2185_v9 }
 0x99a   :  { %2652 = vmatprep.mubr.msk.bf16.mxu0 %vm2933_vm2, %v2932_v15  ;;  %vm2302_vm2 = vcmask 130048  }
 0x99c   :  { %v2279_v39 = vpop.permute.xlu0 %2278 }
 0x99d   :  { %2296 = vst.msk [vmem:[%s3795_s20] sm:$0xff] %vm979_vm4, %v2279_v39 }
 0x9a0   :  { %v2187_v42 = vpop.permute.xlu1 %2186  ;;  %v2283_v41 = vpop.permute.xlu0 %2282 }
 0x9a1   :  { %2298 = vst.msk [vmem:[%s3795_s20 + $0x10] sm:$0xff] %vm979_vm4, %v2283_v41  ;;  %2653 = vmatmul.mubr.msk.bf16.gmra.mrb[72].mxu0 %vm979_vm4, %v2187_v42 }
 0x9a4   :  { %v2281_v59 = vpop.permute.xlu1 %2280  ;;  %v2287_v57 = vpop.permute.xlu0 %2286 }
 0x9a5   :  { %2297 = vst.msk [vmem:[%s3795_s20 + $0x8] sm:$0xff] %vm979_vm4, %v2281_v59  ;;  %2300 = vst.msk [vmem:[%s3795_s20 + $0x20] sm:$0xff] %vm979_vm4, %v2287_v57 }
 0x9a8   :  { %v2285_v15 = vpop.permute.xlu1 %2284 }
 0x9a9   :  { %2299 = vst.msk [vmem:[%s3795_s20 + $0x18] sm:$0xff] %vm979_vm4, %v2285_v15 }
 0x9ac   :  { %v2289_v43 = vpop.permute.xlu1 %2288 }
 0x9ad   :  { %2301 = vst.msk [vmem:[%s3795_s20 + $0x28] sm:$0xff] %vm979_vm4, %v2289_v43 }
 0xa57   :  { %v2243_v45 = vpop.f32.mrb[64].mxu0 }
 0xa58   :  { %v2244_v0 = vadd.f32 %v2474_v20, %v2243_v45  ;;  %v2646_v25 = vpop.f32.mrb[65].mxu0 }
 0xa59   :  { %v2246_v13 = vpop.f32.mrb[66].mxu0 }
 0xa5a   :  { %v2266_v52 = vsel %vm2153_vm6, 0.0, %v2244_v0  ;;  %v2247_v47 = vadd.f32 %v2474_v20, %v2246_v13  ;;  %v2647_v46 = vpop.f32.mrb[67].mxu0 }
 0xa5b   :  { %2303 = vst.msk [vmem:[%s3796_s21] sm:$0xff] %vm2302_vm2, %v2266_v52 }
 0xa5c   :  { %v2267_v53 = vsel %vm2154_vm5, 0.0, %v2247_v47 }
 0xa5d   :  { %2304 = vst.msk [vmem:[%s3796_s21 + $0x8] sm:$0xff] %vm2302_vm2, %v2267_v53 }
 0xa6c   :  { %v2251_v49 = vpop.f32.mrb[68].mxu0 }
 0xa6d   :  { %v2252_v6 = vadd.f32 %v2474_v20, %v2251_v49  ;;  %v2650_v48 = vpop.f32.mrb[69].mxu0 }
 0xa6e   :  { %v2254_v34 = vpop.f32.mrb[70].mxu0 }
 0xa6f   :  { %v2268_v7 = vsel %vm2155_vm8, 0.0, %v2252_v6  ;;  %v2255_v16 = vadd.f32 %v2474_v20, %v2254_v34  ;;  %v2651_v32 = vpop.f32.mrb[71].mxu0 }
 0xa70   :  { %2305 = vst.msk [vmem:[%s3796_s21 + $0x10] sm:$0xff] %vm2302_vm2, %v2268_v7 }
 0xa71   :  { %v2269_v51 = vsel %vm2156_vm7, 0.0, %v2255_v16 }
 0xa72   :  { %2306 = vst.msk [vmem:[%s3796_s21 + $0x18] sm:$0xff] %vm2302_vm2, %v2269_v51 }
 0xa74   :  { %v2259_v17 = vpop.f32.mrb[72].mxu0 }
 0xa75   :  { %v2260_v19 = vadd.f32 %v2474_v20, %v2259_v17  ;;  %v2654_v24 = vpop.f32.mrb[73].mxu0 }
 0xa76   :  { %v2262_v8 = vpop.f32.mrb[74].mxu0 }
 0xa77   :  { %v2270_v22 = vsel %vm2157_vm10, 0.0, %v2260_v19  ;;  %v2263_v29 = vadd.f32 %v2474_v20, %v2262_v8  ;;  %v2655_v23 = vpop.f32.mrb[75].mxu0 }
 0xa78   :  { %2307 = vst.msk [vmem:[%s3796_s21 + $0x20] sm:$0xff] %vm2302_vm2, %v2270_v22 }
 0xa79   :  { %v2271_v14 = vsel %vm2158_vm9, 0.0, %v2263_v29 }
 0xa7a   :  { %2308 = vst.msk [vmem:[%s3796_s21 + $0x28] sm:$0xff] %vm2302_vm2, %v2271_v14 }
 0xa7b   :  { %2317 = vsyncpa [#allocation3], 1 }

</bundles_post_ra>
